<compile_context>
chip_gen: v7x
topology: tpu7x:2x2x1
jax: 0.10.0
libtpu: 0.0.40
codegen_flags: <defaults>
</compile_context>

<pallas_src>
import jax
import jax.numpy as jnp
from jax import lax
from jax.experimental import pallas as pl
from jax.experimental.pallas import tpu as pltpu


def _vmem_budget_bytes():
    """Per-core VMEM capacity (v5e/v6e: 128 MiB, v7x: 64 MiB)."""
    try:
        return int(pltpu.get_tpu_info().vmem_capacity_bytes)
    except Exception:
        return 64 * 1024 * 1024  # conservative fallback (v7x physical per-TC VMEM)


def _make_kernel(H, W, inp, hidden, oup, stride, tr_out, use_res, has_expand):
    """Fused expand(1x1)+ReLU6 -> dw3x3+ReLU6 -> project(1x1) [+residual],
    one strip of `tr_out` output rows per grid step."""
    TRo = tr_out                # output rows per strip
    TRc = TRo * stride          # core input rows per strip
    TRi = TRc + 2               # rows held in the padded scratch
    Wo = W // stride

    def kernel(x_ref, w1_ref, b1_ref, wdw_ref, b2_ref, w3_ref, b3_ref,
               o_ref, pad_ref):
        s = pl.program_id(1)
        ns = pl.num_programs(1)
        row0 = pl.multiple_of(s * TRc, TRc)   # first core input row of this strip

        def expand(x_rows):                   # (R, W, inp) f32 -> (R, W, hidden) f32
            R = x_rows.shape[0]
            if has_expand:
                t = jnp.dot(x_rows.reshape(R * W, inp).astype(jnp.bfloat16),
                            w1_ref[...],
                            preferred_element_type=jnp.float32) + b1_ref[...]
                return jnp.clip(t, 0.0, 6.0).reshape(R, W, hidden)
            return x_rows                     # expand_ratio == 1: pass-through

        # ---- fill the zero-padded scratch for this strip --------------------
        # Only the two 1-px border columns are zeroed (no full-scratch memset);
        # rewritten every step so correctness holds when strips are split
        # across cores.
        zcol = jnp.zeros((TRi, 1, hidden), jnp.float32)
        pad_ref[:, 0:1, :] = zcol
        pad_ref[:, W + 1:W + 2, :] = zcol

        # core rows (always in bounds: strips tile the image exactly)
        xc = x_ref[pl.ds(row0, TRc), :, :]
        pad_ref[1:TRc + 1, 1:W + 1, :] = expand(xc)

        # top halo row: zero at the image border, expanded neighbour row otherwise
        @pl.when(s == 0)
        def _():
            pad_ref[0:1, 1:W + 1, :] = jnp.zeros((1, W, hidden), jnp.float32)

        @pl.when(s > 0)
        def _():
            pad_ref[0:1, 1:W + 1, :] = expand(x_ref[pl.ds(row0 - 1, 1), :, :])

        if stride == 1:
            # bottom halo row is only read by the stride-1 taps
            @pl.when(s == ns - 1)
            def _():
                pad_ref[TRc + 1:TRc + 2, 1:W + 1, :] = jnp.zeros(
                    (1, W, hidden), jnp.float32)

            @pl.when(s < ns - 1)
            def _():
                pad_ref[TRc + 1:TRc + 2, 1:W + 1, :] = expand(
                    x_ref[pl.ds(row0 + TRc, 1), :, :])

        # ---- depthwise 3x3 (+ folded BN) + ReLU6 ----------------------------
        wdw = wdw_ref[...]                    # hoisted: one load, 9 static slices
        acc = jnp.zeros((TRo, Wo, hidden), jnp.float32)
        for kh in range(3):
            for kw in range(3):
                if stride == 1:
                    tap = pad_ref[kh:kh + TRo, kw:kw + W, :]
                else:
                    # stride-2: strided tap reads; accumulate only the needed
                    # (TRo, Wo) outputs (no full-res compute + subsample).
                    tap = pad_ref[pl.ds(kh, TRo, 2), pl.ds(kw, Wo, 2), :]
                acc = acc + tap * wdw[kh:kh + 1, kw:kw + 1, :]
        d = jnp.clip(acc + b2_ref[...].reshape(1, 1, hidden), 0.0, 6.0)

        # ---- project 1x1 (+ folded BN), no activation -----------------------
        y = jnp.dot(d.reshape(TRo * Wo, hidden).astype(jnp.bfloat16),
                    w3_ref[...],
                    preferred_element_type=jnp.float32) + b3_ref[...]
        y = y.reshape(TRo, Wo, oup)

        if use_res:
            # re-read x just for the residual so the input strip is not kept
            # live across the whole body (smaller vreg live ranges).
            y = y + x_ref[pl.ds(row0, TRo), :, :]

        o_ref[...] = y.astype(o_ref.dtype)

    return kernel


class InvertedResidualPallas:
    """JAX/Pallas port of torchvision-style InvertedResidual (deterministic init)."""

    def __init__(self, inp, oup, stride, expand_ratio, key, block_rows=None):
        assert stride in (1, 2)
        self.inp, self.oup, self.stride = inp, oup, stride
        self.hidden = int(round(inp * expand_ratio))
        self.has_expand = expand_ratio != 1
        self.use_res = (stride == 1 and inp == oup)
        self.block_rows = block_rows          # None -> auto from VMEM budget
        eps = 1e-5                            # PyTorch BatchNorm2d default

        ks = jax.random.split(key, 6)

        def bn_fold(k, c):
            kg, kb, km, kv = jax.random.split(k, 4)
            gamma = 1.0 + 0.1 * jax.random.normal(kg, (c,), jnp.float32)
            beta = 0.1 * jax.random.normal(kb, (c,), jnp.float32)
            mean = 0.1 * jax.random.normal(km, (c,), jnp.float32)
            var = jax.random.uniform(kv, (c,), jnp.float32, 0.5, 1.5)
            scale = gamma / jnp.sqrt(var + eps)
            bias = beta - mean * scale
            return scale, bias

        # expand 1x1 conv weight (inp -> hidden), BN folded, stored in bf16
        if self.has_expand:
            w1 = 0.2 * jax.random.normal(ks[0], (inp, self.hidden), jnp.float32)
            s1, b1 = bn_fold(ks[1], self.hidden)
            self.w1 = (w1 * s1[None, :]).astype(jnp.bfloat16)
            self.b1 = b1.reshape(1, self.hidden)
        else:
            self.w1 = jnp.zeros((inp, self.hidden), jnp.bfloat16)   # unused dummy
            self.b1 = jnp.zeros((1, self.hidden), jnp.float32)

        # depthwise 3x3 conv weight, BN folded (kept f32: VPU elementwise work)
        wdw = 0.2 * jax.random.normal(ks[2], (3, 3, self.hidden), jnp.float32)
        s2, b2 = bn_fold(ks[3], self.hidden)
        self.wdw = wdw * s2[None, None, :]
        self.b2 = b2.reshape(1, self.hidden)

        # project 1x1 conv weight (hidden -> oup), BN folded, stored in bf16
        w3 = 0.2 * jax.random.normal(ks[4], (self.hidden, oup), jnp.float32)
        s3, b3 = bn_fold(ks[5], oup)
        self.w3 = (w3 * s3[None, :]).astype(jnp.bfloat16)
        self.b3 = b3.reshape(1, oup)

    def _pick_strip_rows(self, W, Ho):
        if self.block_rows is not None:
            tr = min(self.block_rows, Ho)
        else:
            # ~1/4 of VMEM for the strip working set (pad scratch, strip-sized
            # intermediates, double-buffered output block); leaves headroom for
            # the resident full-image input block and weights.  Capped at 32
            # output rows to bound vreg pressure.
            budget = _vmem_budget_bytes() // 4
            per_row = 4 * (self.stride * (W + 2) * self.hidden     # pad scratch
                           + 3 * W * self.hidden                   # t / acc / d
                           + 2 * (W // self.stride) * self.oup)    # 2x out block
            tr = max(1, min(Ho, budget // max(per_row, 1), 32))
        while Ho % tr:            # largest divisor of Ho not exceeding the target
            tr -= 1
        return tr

    def __call__(self, x_nchw):
        N, C, H, W = x_nchw.shape
        assert C == self.inp
        # PyTorch (pad=1, stride=2) yields ceil sizes for odd inputs; support the
        # common even-size MV2 case explicitly instead of silently truncating.
        assert H % self.stride == 0 and W % self.stride == 0
        Ho, Wo = H // self.stride, W // self.stride

        x = jnp.transpose(x_nchw, (0, 2, 3, 1)).astype(jnp.float32)  # NCHW -> NHWC
        tr_out = self._pick_strip_rows(W, Ho)
        n_strips = Ho // tr_out
        TRc = tr_out * self.stride

        kernel = _make_kernel(H, W, self.inp, self.hidden, self.oup,
                              self.stride, tr_out, self.use_res, self.has_expand)

        out = pl.pallas_call(
            kernel,
            out_shape=jax.ShapeDtypeStruct((N, Ho, Wo, self.oup), jnp.float32),
            grid_spec=pltpu.PrefetchScalarGridSpec(
                num_scalar_prefetch=0,
                grid=(N, n_strips),
                in_specs=[
                    # full image per batch element; block index is constant in
                    # the strip axis so it stays resident across strips.
                    pl.BlockSpec((None, H, W, self.inp),
                                 lambda n, s: (n, 0, 0, 0)),
                    pl.BlockSpec((self.inp, self.hidden), lambda n, s: (0, 0)),
                    pl.BlockSpec((1, self.hidden), lambda n, s: (0, 0)),
                    pl.BlockSpec((3, 3, self.hidden), lambda n, s: (0, 0, 0)),
                    pl.BlockSpec((1, self.hidden), lambda n, s: (0, 0)),
                    pl.BlockSpec((self.hidden, self.oup), lambda n, s: (0, 0)),
                    pl.BlockSpec((1, self.oup), lambda n, s: (0, 0)),
                ],
                out_specs=pl.BlockSpec((None, tr_out, Wo, self.oup),
                                       lambda n, s: (n, s, 0, 0)),
                scratch_shapes=[
                    # zero-padded strip of expanded activations for the dw conv
                    pltpu.VMEM((TRc + 2, W + 2, self.hidden), jnp.float32),
                ],
            ),
            compiler_params=pltpu.CompilerParams(
                dimension_semantics=("parallel", "parallel")),
        )(x, self.w1, self.b1, self.wdw, self.b2, self.w3, self.b3)

        return jnp.transpose(out, (0, 3, 1, 2))  # back to NCHW


def _reference(block, x_nchw):
    """Pure-JAX reference (eval-mode BN folded, bf16 matmul inputs like the kernel)."""
    x = jnp.transpose(x_nchw, (0, 2, 3, 1)).astype(jnp.float32)
    if block.has_expand:
        xq = x.astype(jnp.bfloat16).astype(jnp.float32)
        t = jnp.einsum('nhwc,cd->nhwd', xq, block.w1.astype(jnp.float32))
        t = jnp.clip(t + block.b1.reshape(1, 1, 1, -1), 0.0, 6.0)
    else:
        t = x
    dw = block.wdw.reshape(3, 3, 1, block.hidden)
    d = lax.conv_general_dilated(
        t, dw,
        window_strides=(block.stride, block.stride),
        padding=((1, 1), (1, 1)),
        dimension_numbers=('NHWC', 'HWIO', 'NHWC'),
        feature_group_count=block.hidden)
    d = jnp.clip(d + block.b2.reshape(1, 1, 1, -1), 0.0, 6.0)
    dq = d.astype(jnp.bfloat16).astype(jnp.float32)
    y = jnp.einsum('nhwc,cd->nhwd', dq, block.w3.astype(jnp.float32))
    y = y + block.b3.reshape(1, 1, 1, -1)
    if block.use_res:
        y = y + x
    return jnp.transpose(y, (0, 3, 1, 2))


if __name__ == "__main__":
    key = jax.random.PRNGKey(0)
    kx, kp1, kp2 = jax.random.split(key, 3)

    N, C, H, W = 2, 4, 16, 16
    x = jax.random.normal(kx, (N, C, H, W), jnp.float32)

    # stride=1, expand_ratio=2 (residual path); block_rows=8 gives 2 row strips
    # per image so the cross-strip halo handling is exercised at this small size.
    blk1 = InvertedResidualPallas(inp=4, oup=4, stride=1, expand_ratio=2,
                                  key=kp1, block_rows=8)
    out1 = jax.block_until_ready(blk1(x))
    assert out1.shape == (N, 4, H, W), out1.shape
    ref1 = _reference(blk1, x)
    # bf16 matmul inputs on the MXU vs the XLA reference -> small rounding slack.
    if not jnp.allclose(out1, ref1, atol=1e-2, rtol=1e-2):
        raise AssertionError("stride=1 block does not match the JAX reference")

    # expand_ratio=1 (no expand conv) and inp != oup (no residual).
    blk2 = InvertedResidualPallas(inp=4, oup=6, stride=1, expand_ratio=1,
                                  key=kp2, block_rows=8)
    out2 = jax.block_until_ready(blk2(x))
    assert out2.shape == (N, 6, H, W), out2.shape
    ref2 = _reference(blk2, x)
    if not jnp.allclose(out2, ref2, atol=1e-2, rtol=1e-2):
        raise AssertionError("expand_ratio=1 block does not match the JAX reference")

    print("KERNEL_OK")
</pallas_src>

<mosaic_0001>
module attributes {stable_mosaic.version = 11 : i64} {
  func.func @kernel(%arg0: i32, %arg1: i32, %arg2: memref<1x16x16x4xf32, #tpu.memory_space<vmem>>, %arg3: memref<4x8xbf16, #tpu.memory_space<vmem>>, %arg4: memref<1x8xf32, #tpu.memory_space<vmem>>, %arg5: memref<3x3x8xf32, #tpu.memory_space<vmem>>, %arg6: memref<1x8xf32, #tpu.memory_space<vmem>>, %arg7: memref<8x4xbf16, #tpu.memory_space<vmem>>, %arg8: memref<1x4xf32, #tpu.memory_space<vmem>>, %arg9: memref<1x8x16x4xf32, #tpu.memory_space<vmem>>, %arg10: memref<10x18x8xf32, #tpu.memory_space<vmem>>) attributes {dimension_semantics = [#tpu.dimension_semantics<parallel>, #tpu.dimension_semantics<parallel>], iteration_bounds = array<i64: 2, 2>, scalar_prefetch = 0 : i64, scratch_operands = 1 : i64, tpu.core_type = #tpu.core_type<tc>, window_params = [{transform_indices = @transform_0, window_bounds = array<i64: 1, 16, 16, 4>}, {pipeline_mode = #tpu.pipeline_mode<synchronous>, transform_indices = @transform_1, window_bounds = array<i64: 4, 8>}, {pipeline_mode = #tpu.pipeline_mode<synchronous>, transform_indices = @transform_2, window_bounds = array<i64: 1, 8>}, {pipeline_mode = #tpu.pipeline_mode<synchronous>, transform_indices = @transform_3, window_bounds = array<i64: 3, 3, 8>}, {pipeline_mode = #tpu.pipeline_mode<synchronous>, transform_indices = @transform_4, window_bounds = array<i64: 1, 8>}, {pipeline_mode = #tpu.pipeline_mode<synchronous>, transform_indices = @transform_5, window_bounds = array<i64: 8, 4>}, {pipeline_mode = #tpu.pipeline_mode<synchronous>, transform_indices = @transform_6, window_bounds = array<i64: 1, 4>}, {transform_indices = @transform_7, window_bounds = array<i64: 1, 8, 16, 4>}]} {
    %c8_i32 = arith.constant 8 : i32
    %0 = arith.muli %arg1, %c8_i32 : i32
    %1 = tpu.assume_multiple %0, 8 : i32
    %cst = arith.constant 0.000000e+00 : f32
    %2 = vector.broadcast %cst : f32 to vector<10x1x8xf32>
    %c0 = arith.constant 0 : index
    %c0_0 = arith.constant 0 : index
    %c0_1 = arith.constant 0 : index
    %3 = vector.load %arg10[%c0, %c0_0, %c0_1] : memref<10x18x8xf32, #tpu.memory_space<vmem>>, vector<10x1x8xf32>
    tpu.vector_store %arg10[%c0, %c0_0, %c0_1], %2 {strides = array<i32>} : memref<10x18x8xf32, #tpu.memory_space<vmem>>, vector<10x1x8xf32>,
    %c0_2 = arith.constant 0 : index
    %c17 = arith.constant 17 : index
    %c0_3 = arith.constant 0 : index
    %4 = vector.load %arg10[%c0_2, %c17, %c0_3] : memref<10x18x8xf32, #tpu.memory_space<vmem>>, vector<10x1x8xf32>
    tpu.vector_store %arg10[%c0_2, %c17, %c0_3], %2 {strides = array<i32>} : memref<10x18x8xf32, #tpu.memory_space<vmem>>, vector<10x1x8xf32>,
    %c0_4 = arith.constant 0 : index
    %5 = arith.index_cast %1 : i32 to index
    %c0_5 = arith.constant 0 : index
    %c0_6 = arith.constant 0 : index
    %6 = vector.load %arg2[%c0_4, %5, %c0_5, %c0_6] : memref<1x16x16x4xf32, #tpu.memory_space<vmem>>, vector<1x8x16x4xf32>
    %7 = vector.shape_cast %6 : vector<1x8x16x4xf32> to vector<8x16x4xf32>
    %8 = vector.shape_cast %7 : vector<8x16x4xf32> to vector<128x4xf32>
    %9 = arith.truncf %8 : vector<128x4xf32> to vector<128x4xbf16>
    %c0_7 = arith.constant 0 : index
    %c0_8 = arith.constant 0 : index
    %10 = vector.load %arg3[%c0_7, %c0_8] : memref<4x8xbf16, #tpu.memory_space<vmem>>, vector<4x8xbf16>
    %cst_9 = arith.constant dense<0.000000e+00> : vector<128x8xf32>
    %11 = tpu.matmul %9, %10, %cst_9 {dimension_numbers = #tpu.dot_dimension_numbers<[1], [0], [0], [1], [0, 0, 1, 1], [], []>} : vector<128x4xbf16>, vector<4x8xbf16>, vector<128x8xf32> -> vector<128x8xf32>
    %c0_10 = arith.constant 0 : index
    %c0_11 = arith.constant 0 : index
    %12 = vector.load %arg4[%c0_10, %c0_11] : memref<1x8xf32, #tpu.memory_space<vmem>>, vector<1x8xf32>
    %13 = vector.broadcast %12 : vector<1x8xf32> to vector<128x8xf32>
    %14 = arith.addf %11, %13 : vector<128x8xf32>
    %cst_12 = arith.constant 0.000000e+00 : f32
    %cst_13 = arith.constant 6.000000e+00 : f32
    %15 = vector.broadcast %cst_12 : f32 to vector<128x8xf32>
    %16 = arith.maximumf %15, %14 : vector<128x8xf32>
    %17 = vector.broadcast %cst_13 : f32 to vector<128x8xf32>
    %18 = arith.minimumf %17, %16 : vector<128x8xf32>
    %19 = vector.shape_cast %18 : vector<128x8xf32> to vector<8x16x8xf32>
    %c1 = arith.constant 1 : index
    %c1_14 = arith.constant 1 : index
    %c0_15 = arith.constant 0 : index
    %20 = vector.load %arg10[%c1, %c1_14, %c0_15] : memref<10x18x8xf32, #tpu.memory_space<vmem>>, vector<8x16x8xf32>
    tpu.vector_store %arg10[%c1, %c1_14, %c0_15], %19 {strides = array<i32>} : memref<10x18x8xf32, #tpu.memory_space<vmem>>, vector<8x16x8xf32>,
    %c0_i32 = arith.constant 0 : i32
    %21 = arith.cmpi eq, %arg1, %c0_i32 : i32
    %22 = arith.extui %21 : i1 to i32
    %c0_i32_16 = arith.constant 0 : i32
    %23 = arith.cmpi ne, %22, %c0_i32_16 : i32
    scf.if %23 {
      %cst_68 = arith.constant 0.000000e+00 : f32
      %103 = vector.broadcast %cst_68 : f32 to vector<1x16x8xf32>
      %c0_69 = arith.constant 0 : index
      %c1_70 = arith.constant 1 : index
      %c0_71 = arith.constant 0 : index
      %104 = vector.load %arg10[%c0_69, %c1_70, %c0_71] : memref<10x18x8xf32, #tpu.memory_space<vmem>>, vector<1x16x8xf32>
      tpu.vector_store %arg10[%c0_69, %c1_70, %c0_71], %103 {strides = array<i32>} : memref<10x18x8xf32, #tpu.memory_space<vmem>>, vector<1x16x8xf32>,
    } else {
    }
    %c0_i32_17 = arith.constant 0 : i32
    %24 = arith.cmpi sgt, %arg1, %c0_i32_17 : i32
    %25 = arith.extui %24 : i1 to i32
    %c0_i32_18 = arith.constant 0 : i32
    %26 = arith.cmpi ne, %25, %c0_i32_18 : i32
    scf.if %26 {
      %c1_i32_68 = arith.constant 1 : i32
      %103 = arith.subi %1, %c1_i32_68 : i32
      %c0_69 = arith.constant 0 : index
      %104 = arith.index_cast %103 : i32 to index
      %c0_70 = arith.constant 0 : index
      %c0_71 = arith.constant 0 : index
      %105 = vector.load %arg2[%c0_69, %104, %c0_70, %c0_71] : memref<1x16x16x4xf32, #tpu.memory_space<vmem>>, vector<1x1x16x4xf32>
      %106 = vector.shape_cast %105 : vector<1x1x16x4xf32> to vector<1x16x4xf32>
      %107 = vector.shape_cast %106 : vector<1x16x4xf32> to vector<16x4xf32>
      %108 = arith.truncf %107 : vector<16x4xf32> to vector<16x4xbf16>
      %c0_72 = arith.constant 0 : index
      %c0_73 = arith.constant 0 : index
      %109 = vector.load %arg3[%c0_72, %c0_73] : memref<4x8xbf16, #tpu.memory_space<vmem>>, vector<4x8xbf16>
      %cst_74 = arith.constant dense<0.000000e+00> : vector<16x8xf32>
      %110 = tpu.matmul %108, %109, %cst_74 {dimension_numbers = #tpu.dot_dimension_numbers<[1], [0], [0], [1], [0, 0, 1, 1], [], []>} : vector<16x4xbf16>, vector<4x8xbf16>, vector<16x8xf32> -> vector<16x8xf32>
      %c0_75 = arith.constant 0 : index
      %c0_76 = arith.constant 0 : index
      %111 = vector.load %arg4[%c0_75, %c0_76] : memref<1x8xf32, #tpu.memory_space<vmem>>, vector<1x8xf32>
      %112 = vector.broadcast %111 : vector<1x8xf32> to vector<16x8xf32>
      %113 = arith.addf %110, %112 : vector<16x8xf32>
      %cst_77 = arith.constant 0.000000e+00 : f32
      %cst_78 = arith.constant 6.000000e+00 : f32
      %114 = vector.broadcast %cst_77 : f32 to vector<16x8xf32>
      %115 = arith.maximumf %114, %113 : vector<16x8xf32>
      %116 = vector.broadcast %cst_78 : f32 to vector<16x8xf32>
      %117 = arith.minimumf %116, %115 : vector<16x8xf32>
      %118 = vector.shape_cast %117 : vector<16x8xf32> to vector<1x16x8xf32>
      %c0_79 = arith.constant 0 : index
      %c1_80 = arith.constant 1 : index
      %c0_81 = arith.constant 0 : index
      %119 = vector.load %arg10[%c0_79, %c1_80, %c0_81] : memref<10x18x8xf32, #tpu.memory_space<vmem>>, vector<1x16x8xf32>
      tpu.vector_store %arg10[%c0_79, %c1_80, %c0_81], %118 {strides = array<i32>} : memref<10x18x8xf32, #tpu.memory_space<vmem>>, vector<1x16x8xf32>,
    } else {
    }
    %c1_i32 = arith.constant 1 : i32
    %27 = arith.cmpi eq, %arg1, %c1_i32 : i32
    %28 = arith.extui %27 : i1 to i32
    %c0_i32_19 = arith.constant 0 : i32
    %29 = arith.cmpi ne, %28, %c0_i32_19 : i32
    scf.if %29 {
      %cst_68 = arith.constant 0.000000e+00 : f32
      %103 = vector.broadcast %cst_68 : f32 to vector<1x16x8xf32>
      %c9 = arith.constant 9 : index
      %c1_69 = arith.constant 1 : index
      %c0_70 = arith.constant 0 : index
      %104 = vector.load %arg10[%c9, %c1_69, %c0_70] : memref<10x18x8xf32, #tpu.memory_space<vmem>>, vector<1x16x8xf32>
      tpu.vector_store %arg10[%c9, %c1_69, %c0_70], %103 {strides = array<i32>} : memref<10x18x8xf32, #tpu.memory_space<vmem>>, vector<1x16x8xf32>,
    } else {
    }
    %c1_i32_20 = arith.constant 1 : i32
    %30 = arith.cmpi slt, %arg1, %c1_i32_20 : i32
    %31 = arith.extui %30 : i1 to i32
    %c0_i32_21 = arith.constant 0 : i32
    %32 = arith.cmpi ne, %31, %c0_i32_21 : i32
    scf.if %32 {
      %c8_i32_68 = arith.constant 8 : i32
      %103 = arith.addi %1, %c8_i32_68 : i32
      %c0_69 = arith.constant 0 : index
      %104 = arith.index_cast %103 : i32 to index
      %c0_70 = arith.constant 0 : index
      %c0_71 = arith.constant 0 : index
      %105 = vector.load %arg2[%c0_69, %104, %c0_70, %c0_71] : memref<1x16x16x4xf32, #tpu.memory_space<vmem>>, vector<1x1x16x4xf32>
      %106 = vector.shape_cast %105 : vector<1x1x16x4xf32> to vector<1x16x4xf32>
      %107 = vector.shape_cast %106 : vector<1x16x4xf32> to vector<16x4xf32>
      %108 = arith.truncf %107 : vector<16x4xf32> to vector<16x4xbf16>
      %c0_72 = arith.constant 0 : index
      %c0_73 = arith.constant 0 : index
      %109 = vector.load %arg3[%c0_72, %c0_73] : memref<4x8xbf16, #tpu.memory_space<vmem>>, vector<4x8xbf16>
      %cst_74 = arith.constant dense<0.000000e+00> : vector<16x8xf32>
      %110 = tpu.matmul %108, %109, %cst_74 {dimension_numbers = #tpu.dot_dimension_numbers<[1], [0], [0], [1], [0, 0, 1, 1], [], []>} : vector<16x4xbf16>, vector<4x8xbf16>, vector<16x8xf32> -> vector<16x8xf32>
      %c0_75 = arith.constant 0 : index
      %c0_76 = arith.constant 0 : index
      %111 = vector.load %arg4[%c0_75, %c0_76] : memref<1x8xf32, #tpu.memory_space<vmem>>, vector<1x8xf32>
      %112 = vector.broadcast %111 : vector<1x8xf32> to vector<16x8xf32>
      %113 = arith.addf %110, %112 : vector<16x8xf32>
      %cst_77 = arith.constant 0.000000e+00 : f32
      %cst_78 = arith.constant 6.000000e+00 : f32
      %114 = vector.broadcast %cst_77 : f32 to vector<16x8xf32>
      %115 = arith.maximumf %114, %113 : vector<16x8xf32>
      %116 = vector.broadcast %cst_78 : f32 to vector<16x8xf32>
      %117 = arith.minimumf %116, %115 : vector<16x8xf32>
      %118 = vector.shape_cast %117 : vector<16x8xf32> to vector<1x16x8xf32>
      %c9 = arith.constant 9 : index
      %c1_79 = arith.constant 1 : index
      %c0_80 = arith.constant 0 : index
      %119 = vector.load %arg10[%c9, %c1_79, %c0_80] : memref<10x18x8xf32, #tpu.memory_space<vmem>>, vector<1x16x8xf32>
      tpu.vector_store %arg10[%c9, %c1_79, %c0_80], %118 {strides = array<i32>} : memref<10x18x8xf32, #tpu.memory_space<vmem>>, vector<1x16x8xf32>,
    } else {
    }
    %c0_22 = arith.constant 0 : index
    %c0_23 = arith.constant 0 : index
    %c0_24 = arith.constant 0 : index
    %33 = vector.load %arg5[%c0_22, %c0_23, %c0_24] : memref<3x3x8xf32, #tpu.memory_space<vmem>>, vector<3x3x8xf32>
    %cst_25 = arith.constant 0.000000e+00 : f32
    %34 = vector.broadcast %cst_25 : f32 to vector<8x16x8xf32>
    %c0_26 = arith.constant 0 : index
    %c0_27 = arith.constant 0 : index
    %c0_28 = arith.constant 0 : index
    %35 = vector.load %arg10[%c0_26, %c0_27, %c0_28] : memref<10x18x8xf32, #tpu.memory_space<vmem>>, vector<8x16x8xf32>
    %36 = vector.extract_strided_slice %33 {offsets = [0, 0, 0], sizes = [1, 1, 8], strides = [1, 1, 1]} : vector<3x3x8xf32> to vector<1x1x8xf32>
    %37 = vector.broadcast %36 : vector<1x1x8xf32> to vector<8x16x8xf32>
    %38 = arith.mulf %35, %37 : vector<8x16x8xf32>
    %39 = arith.addf %34, %38 : vector<8x16x8xf32>
    %c0_29 = arith.constant 0 : index
    %c1_30 = arith.constant 1 : index
    %c0_31 = arith.constant 0 : index
    %40 = vector.load %arg10[%c0_29, %c1_30, %c0_31] : memref<10x18x8xf32, #tpu.memory_space<vmem>>, vector<8x16x8xf32>
    %41 = vector.extract_strided_slice %33 {offsets = [0, 1, 0], sizes = [1, 1, 8], strides = [1, 1, 1]} : vector<3x3x8xf32> to vector<1x1x8xf32>
    %42 = vector.broadcast %41 : vector<1x1x8xf32> to vector<8x16x8xf32>
    %43 = arith.mulf %40, %42 : vector<8x16x8xf32>
    %44 = arith.addf %39, %43 : vector<8x16x8xf32>
    %c0_32 = arith.constant 0 : index
    %c2 = arith.constant 2 : index
    %c0_33 = arith.constant 0 : index
    %45 = vector.load %arg10[%c0_32, %c2, %c0_33] : memref<10x18x8xf32, #tpu.memory_space<vmem>>, vector<8x16x8xf32>
    %46 = vector.extract_strided_slice %33 {offsets = [0, 2, 0], sizes = [1, 1, 8], strides = [1, 1, 1]} : vector<3x3x8xf32> to vector<1x1x8xf32>
    %47 = vector.broadcast %46 : vector<1x1x8xf32> to vector<8x16x8xf32>
    %48 = arith.mulf %45, %47 : vector<8x16x8xf32>
    %49 = arith.addf %44, %48 : vector<8x16x8xf32>
    %c1_34 = arith.constant 1 : index
    %c0_35 = arith.constant 0 : index
    %c0_36 = arith.constant 0 : index
    %50 = vector.load %arg10[%c1_34, %c0_35, %c0_36] : memref<10x18x8xf32, #tpu.memory_space<vmem>>, vector<8x16x8xf32>
    %51 = vector.extract_strided_slice %33 {offsets = [1, 0, 0], sizes = [1, 1, 8], strides = [1, 1, 1]} : vector<3x3x8xf32> to vector<1x1x8xf32>
    %52 = vector.broadcast %51 : vector<1x1x8xf32> to vector<8x16x8xf32>
    %53 = arith.mulf %50, %52 : vector<8x16x8xf32>
    %54 = arith.addf %49, %53 : vector<8x16x8xf32>
    %c1_37 = arith.constant 1 : index
    %c1_38 = arith.constant 1 : index
    %c0_39 = arith.constant 0 : index
    %55 = vector.load %arg10[%c1_37, %c1_38, %c0_39] : memref<10x18x8xf32, #tpu.memory_space<vmem>>, vector<8x16x8xf32>
    %56 = vector.extract_strided_slice %33 {offsets = [1, 1, 0], sizes = [1, 1, 8], strides = [1, 1, 1]} : vector<3x3x8xf32> to vector<1x1x8xf32>
    %57 = vector.broadcast %56 : vector<1x1x8xf32> to vector<8x16x8xf32>
    %58 = arith.mulf %55, %57 : vector<8x16x8xf32>
    %59 = arith.addf %54, %58 : vector<8x16x8xf32>
    %c1_40 = arith.constant 1 : index
    %c2_41 = arith.constant 2 : index
    %c0_42 = arith.constant 0 : index
    %60 = vector.load %arg10[%c1_40, %c2_41, %c0_42] : memref<10x18x8xf32, #tpu.memory_space<vmem>>, vector<8x16x8xf32>
    %61 = vector.extract_strided_slice %33 {offsets = [1, 2, 0], sizes = [1, 1, 8], strides = [1, 1, 1]} : vector<3x3x8xf32> to vector<1x1x8xf32>
    %62 = vector.broadcast %61 : vector<1x1x8xf32> to vector<8x16x8xf32>
    %63 = arith.mulf %60, %62 : vector<8x16x8xf32>
    %64 = arith.addf %59, %63 : vector<8x16x8xf32>
    %c2_43 = arith.constant 2 : index
    %c0_44 = arith.constant 0 : index
    %c0_45 = arith.constant 0 : index
    %65 = vector.load %arg10[%c2_43, %c0_44, %c0_45] : memref<10x18x8xf32, #tpu.memory_space<vmem>>, vector<8x16x8xf32>
    %66 = vector.extract_strided_slice %33 {offsets = [2, 0, 0], sizes = [1, 1, 8], strides = [1, 1, 1]} : vector<3x3x8xf32> to vector<1x1x8xf32>
    %67 = vector.broadcast %66 : vector<1x1x8xf32> to vector<8x16x8xf32>
    %68 = arith.mulf %65, %67 : vector<8x16x8xf32>
    %69 = arith.addf %64, %68 : vector<8x16x8xf32>
    %c2_46 = arith.constant 2 : index
    %c1_47 = arith.constant 1 : index
    %c0_48 = arith.constant 0 : index
    %70 = vector.load %arg10[%c2_46, %c1_47, %c0_48] : memref<10x18x8xf32, #tpu.memory_space<vmem>>, vector<8x16x8xf32>
    %71 = vector.extract_strided_slice %33 {offsets = [2, 1, 0], sizes = [1, 1, 8], strides = [1, 1, 1]} : vector<3x3x8xf32> to vector<1x1x8xf32>
    %72 = vector.broadcast %71 : vector<1x1x8xf32> to vector<8x16x8xf32>
    %73 = arith.mulf %70, %72 : vector<8x16x8xf32>
    %74 = arith.addf %69, %73 : vector<8x16x8xf32>
    %c2_49 = arith.constant 2 : index
    %c2_50 = arith.constant 2 : index
    %c0_51 = arith.constant 0 : index
    %75 = vector.load %arg10[%c2_49, %c2_50, %c0_51] : memref<10x18x8xf32, #tpu.memory_space<vmem>>, vector<8x16x8xf32>
    %76 = vector.extract_strided_slice %33 {offsets = [2, 2, 0], sizes = [1, 1, 8], strides = [1, 1, 1]} : vector<3x3x8xf32> to vector<1x1x8xf32>
    %77 = vector.broadcast %76 : vector<1x1x8xf32> to vector<8x16x8xf32>
    %78 = arith.mulf %75, %77 : vector<8x16x8xf32>
    %79 = arith.addf %74, %78 : vector<8x16x8xf32>
    %c0_52 = arith.constant 0 : index
    %c0_53 = arith.constant 0 : index
    %80 = vector.load %arg6[%c0_52, %c0_53] : memref<1x8xf32, #tpu.memory_space<vmem>>, vector<1x8xf32>
    %81 = vector.shape_cast %80 : vector<1x8xf32> to vector<1x1x8xf32>
    %82 = vector.broadcast %81 : vector<1x1x8xf32> to vector<8x16x8xf32>
    %83 = arith.addf %79, %82 : vector<8x16x8xf32>
    %cst_54 = arith.constant 0.000000e+00 : f32
    %cst_55 = arith.constant 6.000000e+00 : f32
    %84 = vector.broadcast %cst_54 : f32 to vector<8x16x8xf32>
    %85 = arith.maximumf %84, %83 : vector<8x16x8xf32>
    %86 = vector.broadcast %cst_55 : f32 to vector<8x16x8xf32>
    %87 = arith.minimumf %86, %85 : vector<8x16x8xf32>
    %88 = vector.shape_cast %87 : vector<8x16x8xf32> to vector<128x8xf32>
    %89 = arith.truncf %88 : vector<128x8xf32> to vector<128x8xbf16>
    %c0_56 = arith.constant 0 : index
    %c0_57 = arith.constant 0 : index
    %90 = vector.load %arg7[%c0_56, %c0_57] : memref<8x4xbf16, #tpu.memory_space<vmem>>, vector<8x4xbf16>
    %cst_58 = arith.constant dense<0.000000e+00> : vector<128x4xf32>
    %91 = tpu.matmul %89, %90, %cst_58 {dimension_numbers = #tpu.dot_dimension_numbers<[1], [0], [0], [1], [0, 0, 1, 1], [], []>} : vector<128x8xbf16>, vector<8x4xbf16>, vector<128x4xf32> -> vector<128x4xf32>
    %c0_59 = arith.constant 0 : index
    %c0_60 = arith.constant 0 : index
    %92 = vector.load %arg8[%c0_59, %c0_60] : memref<1x4xf32, #tpu.memory_space<vmem>>, vector<1x4xf32>
    %93 = vector.broadcast %92 : vector<1x4xf32> to vector<128x4xf32>
    %94 = arith.addf %91, %93 : vector<128x4xf32>
    %95 = vector.shape_cast %94 : vector<128x4xf32> to vector<8x16x4xf32>
    %c0_61 = arith.constant 0 : index
    %96 = arith.index_cast %1 : i32 to index
    %c0_62 = arith.constant 0 : index
    %c0_63 = arith.constant 0 : index
    %97 = vector.load %arg2[%c0_61, %96, %c0_62, %c0_63] : memref<1x16x16x4xf32, #tpu.memory_space<vmem>>, vector<1x8x16x4xf32>
    %98 = vector.shape_cast %97 : vector<1x8x16x4xf32> to vector<8x16x4xf32>
    %99 = arith.addf %95, %98 : vector<8x16x4xf32>
    %c0_64 = arith.constant 0 : index
    %c0_65 = arith.constant 0 : index
    %c0_66 = arith.constant 0 : index
    %c0_67 = arith.constant 0 : index
    %100 = vector.load %arg9[%c0_64, %c0_65, %c0_66, %c0_67] : memref<1x8x16x4xf32, #tpu.memory_space<vmem>>, vector<1x8x16x4xf32>
    %101 = vector.shape_cast %100 : vector<1x8x16x4xf32> to vector<8x16x4xf32>
    %102 = vector.shape_cast %99 : vector<8x16x4xf32> to vector<1x8x16x4xf32>
    tpu.vector_store %arg9[%c0_64, %c0_65, %c0_66, %c0_67], %102 {strides = array<i32>} : memref<1x8x16x4xf32, #tpu.memory_space<vmem>>, vector<1x8x16x4xf32>,
    return
  }
  func.func @transform_0(%arg0: i32, %arg1: i32) -> (i32, i32, i32, i32) {
    %c0_i32 = arith.constant 0 : i32
    %c0_i32_0 = arith.constant 0 : i32
    %c0_i32_1 = arith.constant 0 : i32
    %c0_i32_2 = arith.constant 0 : i32
    return %arg0, %c0_i32, %c0_i32_0, %c0_i32_1 : i32, i32, i32, i32
  }
  func.func @transform_1(%arg0: i32, %arg1: i32) -> (i32, i32) {
    %c0_i32 = arith.constant 0 : i32
    %c0_i32_0 = arith.constant 0 : i32
    %c0_i32_1 = arith.constant 0 : i32
    return %c0_i32, %c0_i32_0 : i32, i32
  }
  func.func @transform_2(%arg0: i32, %arg1: i32) -> (i32, i32) {
    %c0_i32 = arith.constant 0 : i32
    %c0_i32_0 = arith.constant 0 : i32
    %c0_i32_1 = arith.constant 0 : i32
    return %c0_i32, %c0_i32_0 : i32, i32
  }
  func.func @transform_3(%arg0: i32, %arg1: i32) -> (i32, i32, i32) {
    %c0_i32 = arith.constant 0 : i32
    %c0_i32_0 = arith.constant 0 : i32
    %c0_i32_1 = arith.constant 0 : i32
    %c0_i32_2 = arith.constant 0 : i32
    return %c0_i32, %c0_i32_0, %c0_i32_1 : i32, i32, i32
  }
  func.func @transform_4(%arg0: i32, %arg1: i32) -> (i32, i32) {
    %c0_i32 = arith.constant 0 : i32
    %c0_i32_0 = arith.constant 0 : i32
    %c0_i32_1 = arith.constant 0 : i32
    return %c0_i32, %c0_i32_0 : i32, i32
  }
  func.func @transform_5(%arg0: i32, %arg1: i32) -> (i32, i32) {
    %c0_i32 = arith.constant 0 : i32
    %c0_i32_0 = arith.constant 0 : i32
    %c0_i32_1 = arith.constant 0 : i32
    return %c0_i32, %c0_i32_0 : i32, i32
  }
  func.func @transform_6(%arg0: i32, %arg1: i32) -> (i32, i32) {
    %c0_i32 = arith.constant 0 : i32
    %c0_i32_0 = arith.constant 0 : i32
    %c0_i32_1 = arith.constant 0 : i32
    return %c0_i32, %c0_i32_0 : i32, i32
  }
  func.func @transform_7(%arg0: i32, %arg1: i32) -> (i32, i32, i32, i32) {
    %c0_i32 = arith.constant 0 : i32
    %c0_i32_0 = arith.constant 0 : i32
    %c0_i32_1 = arith.constant 0 : i32
    return %arg0, %arg1, %c0_i32, %c0_i32_0 : i32, i32, i32, i32
  }
}

</mosaic_0001>

<bundles_post_ra>
// kernel: tpu_custom_call.1
= control target key start
LH: loop header
LB: loop body
LE: loop exit
PB: predicated region body
PF: predicated region fallthrough
CT: control target
= control target key end

     0   :  { %s1770_s24 = smov 0   ;;  %s1772_s25 = smov 0   ;;  %s2461_s0 = inlined_call_operand.vmem [shape: f32[2,16,16,4], index: 0, kind: input, shape index: {}]   ;;  %s2462_s1 = inlined_call_operand.vmem [shape: bf16[4,8], index: 1, kind: input, shape index: {}]   ;;  %s2463_s2 = inlined_call_operand.vmem [shape: f32[1,8], index: 2, kind: input, shape index: {}]   ;;  %s2464_s3 = inlined_call_operand.vmem [shape: f32[3,3,8], index: 3, kind: input, shape index: {}]   ;;  %s2465_s4 = inlined_call_operand.vmem [shape: f32[1,8], index: 4, kind: input, shape index: {}]   ;;  %s2466_s5 = inlined_call_operand.vmem [shape: bf16[8,4], index: 5, kind: input, shape index: {}]   ;;  %s2467_s6 = inlined_call_operand.vmem [shape: f32[1,4], index: 6, kind: input, shape index: {}]   ;;  %s2468_s7 = inlined_call_operand.vmem [shape: f32[2,16,16,4], index: 7, kind: output, shape index: {}]  }
   0x1   :  { %s1774_s26 = smov 0   ;;  %s1776_s27 = smov 0  }
   0x2   :  { %s1778_s28 = smov 0  }
   0x3 LB: > { %s26_s29 = sadd.s32 1, %s1713_s26  ;;  %s29_s30 = sadd.s32 1, %s1717_s27  ;;  %s1721_s28 = sphi %s1778_s28, %s17_s28   ;;  %s1717_s27 = sphi %s1776_s27, %s2491_s27   ;;  %s1713_s26 = sphi %s1774_s26, %s2490_s26   ;;  %s1709_s25 = sphi %s1772_s25, %s2489_s25   ;;  %s1705_s24 = sphi %s1770_s24, %s2488_s24  }
   0x4   : > { %p27_p0 = scmp.ge.s32.totalorder %s26_s29, 2  ;;  %p1511_p1 = scmp.ge.s32.totalorder %s1721_s28, 1 }
   0x5   : > { %p251_p2 = scmp.lt.s32.totalorder %s1721_s28, 5 }
   0x6   : > { %s2493_s29 = smov (%p27_p0, %s26_s29), 0  ;;  %s2495_s30 = smov (!%p27_p0, %s29_s30), %s1717_s27 }
   0x7   : > { %p252_p3 = pnand %p1511_p1, %p251_p2  ;;  %p31_p4 = scmp.ge.s32.totalorder %s2495_s30, 2 }
   0x9   : > { %s2497_s30 = smov (%p31_p4, %s2495_s30), 0  ;;  %255 = sbr.rel (%p252_p3) target bundleno = 1046 (0x416), region = 48 }
  0x10   : > { %vm306_vm0 = vcmask 57344   ;;  %v353_v0 = vld [vmem:[%s2462_s1] sm:$0x3]  ;;  %vm386_vm1 = vcmask 1041408   ;;  %p288_p5 = scmp.lt.s32.totalorder %s1709_s25, 1  ;;  %v1723_v1 = vmov 0.0  }
  0x11   : > { %307 = vst.msk [vmem:[#allocation2] sm:$0x1] %vm306_vm0, %v1723_v1  ;;  %308 = vst.msk [vmem:[#allocation2 + $0x18] sm:$0x1] %vm306_vm0, %v1723_v1  ;;  %1632 = vmatprep.subr.msk.bf16.mxu0 %vm386_vm1, %v353_v0  ;;  %1633 = vmatprep.subr.msk.bf16.mxu1 %vm386_vm1, %v353_v0  ;;  %v388_v2 = vsel %vm386_vm1, %v353_v0, 0  ;;  %s1832_s10 = sshll.u32 %s1705_s24, 3 }
  0x12   : > { %309 = vst.msk [vmem:[#allocation2 + $0x30] sm:$0x1] %vm306_vm0, %v1723_v1  ;;  %310 = vst.msk [vmem:[#allocation2 + $0x48] sm:$0x1] %vm306_vm0, %v1723_v1  ;;  %1581 = vmatpush3.bf16.msra.mxu0 %v388_v2  ;;  %1629 = vmatpush3.bf16.msra.mxu1 %v388_v2  ;;  %s2499_s25 = smov (!%p288_p5, %s1709_s25), 1  ;;  %p296_p6 = scmp.lt.s32.totalorder %s1832_s10, 15 }
  0x13   : > { %311 = vst.msk [vmem:[#allocation2 + $0x60] sm:$0x1] %vm306_vm0, %v1723_v1  ;;  %312 = vst.msk [vmem:[#allocation2 + $0x78] sm:$0x1] %vm306_vm0, %v1723_v1  ;;  %s1555_s11 = sshll.u32 %s2499_s25, 8  ;;  %s1556_s12 = sshll.u32 %s1705_s24, 7 }
  0x14   : > { %313 = vst.msk [vmem:[#allocation2 + $0x90] sm:$0x1] %vm306_vm0, %v1723_v1  ;;  %314 = vst.msk [vmem:[#allocation2 + $0xa8] sm:$0x1] %vm306_vm0, %v1723_v1  ;;  %s1842_s15 = scalar_lea.vmem %s2461_s0, %s1555_s11  ;;  %s1516_s16 = sshll.u32 %s2499_s25, 5  ;;  %vm361_vm2 = vcmask 31744  }
  0x15   : > { %315 = vst.msk [vmem:[#allocation2 + $0xc0] sm:$0x1] %vm306_vm0, %v1723_v1  ;;  %316 = vst.msk [vmem:[#allocation2 + $0xd8] sm:$0x1] %vm306_vm0, %v1723_v1  ;;  %s297_s17 = scalar_select %p296_p6, %s1832_s10, 15  ;;  %vm520_vm3 = vcmask 64512  }
  0x16   : > { %317 = vst.msk [vmem:[#allocation2 + $0x11] sm:$0x1] %vm306_vm0, %v1723_v1  ;;  %318 = vst.msk [vmem:[#allocation2 + $0x29] sm:$0x1] %vm306_vm0, %v1723_v1  ;;  %s1846_s18 = scalar_lea.vmem %s1842_s15, %s1556_s12  ;;  %v1880_v27 = vld [vmem:[%s2463_s2] ss:$0 sm:$0xff] }
  0x17   : > { %319 = vst.msk [vmem:[#allocation2 + $0x41] sm:$0x1] %vm306_vm0, %v1723_v1  ;;  %320 = vst.msk [vmem:[#allocation2 + $0x59] sm:$0x1] %vm306_vm0, %v1723_v1  ;;  %s1515_s19 = sshll.u32 %s297_s17, 1  ;;  %v329_v3 = vld [vmem:[%s1846_s18] sm:$0xff] }
  0x18   : > { %321 = vst.msk [vmem:[#allocation2 + $0x71] sm:$0x1] %vm306_vm0, %v1723_v1  ;;  %322 = vst.msk [vmem:[#allocation2 + $0x89] sm:$0x1] %vm306_vm0, %v1723_v1  ;;  %v330_v4 = vld [vmem:[%s1846_s18 + $0x8] sm:$0xff]  ;;  %v337_v5 = vld [vmem:[%s1846_s18 + $0x40] sm:$0xff]  ;;  %s300_s20 = sadd.s32 %s1516_s16, %s1515_s19 }
  0x19   : > { %323 = vst.msk [vmem:[#allocation2 + $0xa1] sm:$0x1] %vm306_vm0, %v1723_v1  ;;  %324 = vst.msk [vmem:[#allocation2 + $0xb9] sm:$0x1] %vm306_vm0, %v1723_v1  ;;  %v345_v6 = vpack.c.bf16 %v330_v4, %v329_v3  ;;  %v338_v7 = vld [vmem:[%s1846_s18 + $0x48] sm:$0xff]  ;;  %v331_v8 = vld [vmem:[%s1846_s18 + $0x10] sm:$0xff] }
  0x1a   : > { %325 = vst.msk [vmem:[#allocation2 + $0xd1] sm:$0x1] %vm306_vm0, %v1723_v1  ;;  %326 = vst.msk [vmem:[#allocation2 + $0xe9] sm:$0x1] %vm306_vm0, %v1723_v1  ;;  %v332_v9 = vld [vmem:[%s1846_s18 + $0x18] sm:$0xff]  ;;  %s1517_s21 = sshll.u32 %s300_s20, 3  ;;  %v349_v10 = vpack.c.bf16 %v338_v7, %v337_v5 }
  0x1b   : > { %v346_v11 = vpack.c.bf16 %v332_v9, %v331_v8  ;;  %v339_v12 = vld [vmem:[%s1846_s18 + $0x50] sm:$0xff]  ;;  %v340_v13 = vld [vmem:[%s1846_s18 + $0x58] sm:$0xff]  ;;  %v333_v14 = vld [vmem:[%s1846_s18 + $0x20] sm:$0xff]  ;;  %s1860_s25 = scalar_lea.vmem %s2468_s7, %s1517_s21  ;;  %1582 = vmatprep.mubr.msk.bf16.mxu0 %vm361_vm2, %v345_v6  ;;  %p1529_p7 = scmp.ne.s32.totalorder %s1705_s24, 0 }
  0x1c   : > { %v350_v15 = vpack.c.bf16 %v340_v13, %v339_v12  ;;  %v334_v16 = vld [vmem:[%s1846_s18 + $0x28] sm:$0xff]  ;;  %v341_v17 = vld [vmem:[%s1846_s18 + $0x60] sm:$0xff]  ;;  %1590 = vmatprep.mubr.msk.bf16.mxu1 %vm361_vm2, %v349_v10  ;;  %v335_v21 = vld [vmem:[%s1846_s18 + $0x30] sm:$0xff] }
  0x1d   : > { %v342_v18 = vld [vmem:[%s1846_s18 + $0x68] sm:$0xff]  ;;  %1583 = vmatmul.mubr.msk.bf16.vlgmr.msra.gmra.mrb[0].mxu0 %vm361_vm2, %v346_v11  ;;  %v347_v19 = vpack.c.bf16 %v334_v16, %v333_v14  ;;  %v336_v22 = vld [vmem:[%s1846_s18 + $0x38] sm:$0xff]  ;;  %v343_v23 = vld [vmem:[%s1846_s18 + $0x70] sm:$0xff] }
  0x1e   : > { %v351_v20 = vpack.c.bf16 %v342_v18, %v341_v17  ;;  %1591 = vmatmul.mubr.msk.bf16.vlgmr.msra.gmra.mrb[0].mxu1 %vm361_vm2, %v350_v15  ;;  %v344_v24 = vld [vmem:[%s1846_s18 + $0x78] sm:$0xff]  ;;  %v348_v25 = vpack.c.bf16 %v336_v22, %v335_v21 }
  0x1f   : > { %1586 = vmatprep.mubr.msk.bf16.mxu0 %vm361_vm2, %v347_v19  ;;  %v352_v26 = vpack.c.bf16 %v344_v24, %v343_v23 }
  0x20   : > { %1594 = vmatprep.mubr.msk.bf16.mxu1 %vm361_vm2, %v351_v20 }
  0x25   : > { %1587 = vmatmul.mubr.msk.bf16.gmra.mrb[4].mxu0 %vm361_vm2, %v348_v25 }
  0x26   : > { %1595 = vmatmul.mubr.msk.bf16.gmra.mrb[4].mxu1 %vm361_vm2, %v352_v26 }
  0xf0   : > { %v1584_v28 = vpop.f32.mrb[0].mxu0 }
  0xf1   : > { %v433_v29 = vadd.f32 %v1584_v28, %v1880_v27  ;;  %v1592_v30 = vpop.f32.mrb[0].mxu1  ;;  %v424_v31 = vpop.f32.mrb[1].mxu0  ;;  %v1724_v28 = vmov (!%p1529_p7), 0.0  }
  0xf2   : > { %v465_v32 = vadd.f32 %v1592_v30, %v1880_v27  ;;  %v425_v33 = vadd.f32 %v1880_v27, %v424_v31  ;;  %v456_v34 = vpop.f32.mrb[1].mxu1  ;;  %v1585_v35 = vpop.f32.mrb[2].mxu0  ;;  %541 = vst.msk [vmem:[#allocation2 + $0x1] sm:$0xff] (!%p1529_p7), %vm520_vm3, %v1724_v28  ;;  %542 = vst.msk [vmem:[#allocation2 + $0x9] sm:$0xff] (!%p1529_p7), %vm520_vm3, %v1724_v28 }
  0xf3   : > { %v489_v36 = vmax.f32 %v433_v29, 0.0  ;;  %v457_v37 = vadd.f32 %v1880_v27, %v456_v34  ;;  %v436_v38 = vadd.f32 %v1585_v35, %v1880_v27  ;;  %v1593_v39 = vpop.f32.mrb[2].mxu1  ;;  %v427_v40 = vpop.f32.mrb[3].mxu0 }
  0xf4   : > { %v497_v41 = vmax.f32 %v465_v32, 0.0  ;;  %v487_v42 = vmax.f32 %v425_v33, 0.0  ;;  %v468_v43 = vadd.f32 %v1593_v39, %v1880_v27  ;;  %v428_v44 = vadd.f32 %v1880_v27, %v427_v40  ;;  %v459_v45 = vpop.f32.mrb[3].mxu1 }
  0xf5   : > { %v505_v46 = vmin.f32 %v489_v36, 6.0  ;;  %v495_v47 = vmax.f32 %v457_v37, 0.0  ;;  %v490_v48 = vmax.f32 %v436_v38, 0.0  ;;  %v460_v49 = vadd.f32 %v1880_v27, %v459_v45 }
  0xf6   : > { %v513_v50 = vmin.f32 %v497_v41, 6.0  ;;  %v503_v51 = vmin.f32 %v487_v42, 6.0  ;;  %v498_v52 = vmax.f32 %v468_v43, 0.0  ;;  %v488_v53 = vmax.f32 %v428_v44, 0.0 }
  0xf7   : > { %523 = vst.msk [vmem:[#allocation2 + $0x31] sm:$0xff] %vm520_vm3, %v505_v46  ;;  %v511_v54 = vmin.f32 %v495_v47, 6.0  ;;  %v506_v55 = vmin.f32 %v490_v48, 6.0  ;;  %v496_v56 = vmax.f32 %v460_v49, 0.0 }
  0xf8   : > { %531 = vst.msk [vmem:[#allocation2 + $0x91] sm:$0xff] %vm520_vm3, %v513_v50  ;;  %521 = vst.msk [vmem:[#allocation2 + $0x19] sm:$0xff] %vm520_vm3, %v503_v51  ;;  %v514_v57 = vmin.f32 %v498_v52, 6.0  ;;  %v504_v58 = vmin.f32 %v488_v53, 6.0  ;;  %v1588_v59 = vpop.f32.mrb[4].mxu0 }
  0xf9   : > { %529 = vst.msk [vmem:[#allocation2 + $0x79] sm:$0xff] %vm520_vm3, %v511_v54  ;;  %524 = vst.msk [vmem:[#allocation2 + $0x39] sm:$0xff] %vm520_vm3, %v506_v55  ;;  %v512_v60 = vmin.f32 %v496_v56, 6.0  ;;  %v449_v61 = vadd.f32 %v1588_v59, %v1880_v27  ;;  %v1596_v62 = vpop.f32.mrb[4].mxu1  ;;  %v440_v63 = vpop.f32.mrb[5].mxu0 }
  0xfa   : > { %532 = vst.msk [vmem:[#allocation2 + $0x99] sm:$0xff] %vm520_vm3, %v514_v57  ;;  %522 = vst.msk [vmem:[#allocation2 + $0x21] sm:$0xff] %vm520_vm3, %v504_v58  ;;  %v481_v0 = vadd.f32 %v1596_v62, %v1880_v27  ;;  %v441_v1 = vadd.f32 %v1880_v27, %v440_v63  ;;  %v472_v2 = vpop.f32.mrb[5].mxu1  ;;  %v1589_v3 = vpop.f32.mrb[6].mxu0 }
  0xfb   : > { %530 = vst.msk [vmem:[#allocation2 + $0x81] sm:$0xff] %vm520_vm3, %v512_v60  ;;  %v493_v4 = vmax.f32 %v449_v61, 0.0  ;;  %v473_v5 = vadd.f32 %v1880_v27, %v472_v2  ;;  %v452_v6 = vadd.f32 %v1589_v3, %v1880_v27  ;;  %v1597_v7 = vpop.f32.mrb[6].mxu1  ;;  %v443_v8 = vpop.f32.mrb[7].mxu0 }
  0xfc   : > { %v501_v9 = vmax.f32 %v481_v0, 0.0  ;;  %v491_v10 = vmax.f32 %v441_v1, 0.0  ;;  %v484_v11 = vadd.f32 %v1597_v7, %v1880_v27  ;;  %v444_v12 = vadd.f32 %v1880_v27, %v443_v8  ;;  %v475_v13 = vpop.f32.mrb[7].mxu1 }
  0xfd   : > { %v509_v14 = vmin.f32 %v493_v4, 6.0  ;;  %v499_v15 = vmax.f32 %v473_v5, 0.0  ;;  %v494_v16 = vmax.f32 %v452_v6, 0.0  ;;  %v476_v17 = vadd.f32 %v1880_v27, %v475_v13  ;;  %540 = sbr.rel (%p1529_p7) target bundleno = 260 (0x104), region = 52 }
  0xfe   : > { %v517_v18 = vmin.f32 %v501_v9, 6.0  ;;  %v507_v19 = vmin.f32 %v491_v10, 6.0  ;;  %v502_v20 = vmax.f32 %v484_v11, 0.0  ;;  %v492_v21 = vmax.f32 %v444_v12, 0.0 }
  0xff   : > { %527 = vst.msk [vmem:[#allocation2 + $0x61] sm:$0xff] %vm520_vm3, %v509_v14  ;;  %v515_v22 = vmin.f32 %v499_v15, 6.0  ;;  %v510_v23 = vmin.f32 %v494_v16, 6.0  ;;  %v500_v24 = vmax.f32 %v476_v17, 0.0 }
 0x100   : > { %535 = vst.msk [vmem:[#allocation2 + $0xc1] sm:$0xff] %vm520_vm3, %v517_v18  ;;  %525 = vst.msk [vmem:[#allocation2 + $0x49] sm:$0xff] %vm520_vm3, %v507_v19  ;;  %v518_v25 = vmin.f32 %v502_v20, 6.0  ;;  %v508_v26 = vmin.f32 %v492_v21, 6.0 }
 0x101   : > { %533 = vst.msk [vmem:[#allocation2 + $0xa9] sm:$0xff] %vm520_vm3, %v515_v22  ;;  %528 = vst.msk [vmem:[#allocation2 + $0x69] sm:$0xff] %vm520_vm3, %v510_v23  ;;  %v516_v27 = vmin.f32 %v500_v24, 6.0 }
 0x102   : > { %536 = vst.msk [vmem:[#allocation2 + $0xc9] sm:$0xff] %vm520_vm3, %v518_v25  ;;  %526 = vst.msk [vmem:[#allocation2 + $0x51] sm:$0xff] %vm520_vm3, %v508_v26 }
 0x103   : > { %534 = vst.msk [vmem:[#allocation2 + $0xb1] sm:$0xff] %vm520_vm3, %v516_v27 }
 0x104 PF: > { %p1530_p8 = scmp.le.s32.totalorder %s1705_s24, 0 }
 0x105   : > { %v553_v29 = vld [vmem:[%s2462_s1] sm:$0x3] (!%p1530_p8)  ;;  %s1531_s13 = sadd.s32 (!%p1530_p8), 4294967295, %s1832_s10  ;;  %v1725_v30 = vmov (!%p1530_p8), 0.0   ;;  %vm1726_vm4 = vmmov (!%p1530_p8), 0  }
 0x106   : > { %546 = sbr.rel (%p1530_p8) target bundleno = 488 (0x1e8), region = 56  ;;  %1598 = vmatprep.subr.bf16.mxu0 (!%p1530_p8), %v1725_v30  ;;  %v565_v31 = vsel (!%p1530_p8), %vm386_vm1, %v553_v29, 0  ;;  %1600 = vmatprep.mubr.msk.bf16.mxu0 (!%p1530_p8), %vm1726_vm4, %v1725_v30  ;;  %s1532_s14 = sshll.u32 (!%p1530_p8), %s1531_s13, 4  ;;  %v1533_v35 = vld [vmem:[%s2463_s2] ss:$0 sm:$0xff] (!%p1530_p8) }
 0x107   : > { %1599 = vmatpush3.bf16.msra.mxu0 (!%p1530_p8), %v565_v31  ;;  %s549_s16 = scalar_lea.vmem (!%p1530_p8), %s1842_s15, %s1532_s14 }
 0x108   : > { %v550_v32 = vld [vmem:[%s549_s16] sm:$0xff] (!%p1530_p8)  ;;  %v551_v33 = vld [vmem:[%s549_s16 + $0x8] sm:$0xff] (!%p1530_p8) }
 0x109   : > { %v552_v34 = vpack.c.bf16 (!%p1530_p8), %v551_v33, %v550_v32 }
 0x10b   : > { %1601 = vmatmul.mubr.msk.bf16.vlgmr.msra.gmra.mrb[0].mxu0 (!%p1530_p8), %vm361_vm2, %v552_v34 }
 0x1de   : > { %v601_v36 = vpop.f32.mrb[0].mxu0 }
 0x1df   : > { %v602_v37 = vadd.f32 %v1533_v35, %v601_v36  ;;  %v1602_v38 = vpop.f32.mrb[1].mxu0 }
 0x1e0   : > { %v604_v39 = vpop.f32.mrb[2].mxu0 }
 0x1e1   : > { %v608_v40 = vmax.f32 %v602_v37, 0.0  ;;  %v605_v41 = vadd.f32 %v1533_v35, %v604_v39  ;;  %v1603_v42 = vpop.f32.mrb[3].mxu0 }
 0x1e3   : > { %v610_v43 = vmin.f32 %v608_v40, 6.0  ;;  %v609_v44 = vmax.f32 %v605_v41, 0.0 }
 0x1e5   : > { %612 = vst.msk [vmem:[#allocation2 + $0x1] sm:$0xff] %vm520_vm3, %v610_v43  ;;  %v611_v45 = vmin.f32 %v609_v44, 6.0 }
 0x1e7   : > { %613 = vst.msk [vmem:[#allocation2 + $0x9] sm:$0xff] %vm520_vm3, %v611_v45 }
 0x1e8 PF: > { %p1535_p9 = scmp.ne.s32.totalorder %s1705_s24, 1 }
 0x1e9   : > { %v1727_v46 = vmov (!%p1535_p9), 0.0  }
 0x1ea   : > { %617 = sbr.rel (%p1535_p9) target bundleno = 497 (0x1f1), region = 60  ;;  %619 = vst.msk [vmem:[#allocation2 + $0xd9] sm:$0xff] (!%p1535_p9), %vm520_vm3, %v1727_v46  ;;  %620 = vst.msk [vmem:[#allocation2 + $0xe1] sm:$0xff] (!%p1535_p9), %vm520_vm3, %v1727_v46 }
 0x1f1 PF: > { %p1536_p10 = scmp.ge.s32.totalorder %s1705_s24, 1 }
 0x1f2   : > { %v631_v47 = vld [vmem:[%s2462_s1] sm:$0x3] (!%p1536_p10)  ;;  %v1540_v49 = vld [vmem:[%s1846_s18 + $0x88] sm:$0xff] (!%p1536_p10)  ;;  %v1728_v50 = vmov (!%p1536_p10), 0.0   ;;  %vm1729_vm5 = vmmov (!%p1536_p10), 0  }
 0x1f3   : > { %624 = sbr.rel (%p1536_p10) target bundleno = 724 (0x2d4), region = 64  ;;  %v1539_v48 = vld [vmem:[%s1846_s18 + $0x80] sm:$0xff] (!%p1536_p10)  ;;  %1604 = vmatprep.subr.bf16.mxu0 (!%p1536_p10), %v1728_v50  ;;  %v643_v51 = vsel (!%p1536_p10), %vm386_vm1, %v631_v47, 0  ;;  %1606 = vmatprep.mubr.msk.bf16.mxu0 (!%p1536_p10), %vm1729_vm5, %v1728_v50 }
 0x1f4   : > { %v630_v52 = vpack.c.bf16 (!%p1536_p10), %v1540_v49, %v1539_v48  ;;  %1605 = vmatpush3.bf16.msra.mxu0 (!%p1536_p10), %v643_v51  ;;  %v1541_v53 = vld [vmem:[%s2463_s2] ss:$0 sm:$0xff] (!%p1536_p10) }
 0x1f7   : > { %1607 = vmatmul.mubr.msk.bf16.vlgmr.msra.gmra.mrb[0].mxu0 (!%p1536_p10), %vm361_vm2, %v630_v52 }
 0x2ca   : > { %v679_v54 = vpop.f32.mrb[0].mxu0 }
 0x2cb   : > { %v680_v55 = vadd.f32 %v1541_v53, %v679_v54  ;;  %v1608_v56 = vpop.f32.mrb[1].mxu0 }
 0x2cc   : > { %v682_v57 = vpop.f32.mrb[2].mxu0 }
 0x2cd   : > { %v686_v58 = vmax.f32 %v680_v55, 0.0  ;;  %v683_v59 = vadd.f32 %v1541_v53, %v682_v57  ;;  %v1609_v60 = vpop.f32.mrb[3].mxu0 }
 0x2cf   : > { %v688_v61 = vmin.f32 %v686_v58, 6.0  ;;  %v687_v62 = vmax.f32 %v683_v59, 0.0 }
 0x2d1   : > { %691 = vst.msk [vmem:[#allocation2 + $0xd9] sm:$0xff] %vm520_vm3, %v688_v61  ;;  %v689_v63 = vmin.f32 %v687_v62, 6.0 }
 0x2d3   : > { %692 = vst.msk [vmem:[#allocation2 + $0xe1] sm:$0xff] %vm520_vm3, %v689_v63 }
 0x2d4 PF: > { %v1228_v0 = vld [vmem:[%s2466_s5] sm:$0xf]  ;;  %vm1260_vm6 = vcmask 1043456   ;;  %v712_v1 = vlaneseq  ;;  %v694_v5 = vld [vmem:[%s2464_s3 + $0x4] sm:$0x7]  ;;  %v697_v11 = vld [vmem:[#allocation2 + $0x8] sm:$0xff] }
 0x2d5   : > { %1634 = vmatprep.subr.msk.bf16.mxu0 %vm1260_vm6, %v1228_v0  ;;  %1635 = vmatprep.subr.msk.bf16.mxu1 %vm1260_vm6, %v1228_v0  ;;  %v1262_v2 = vsel %vm1260_vm6, %v1228_v0, 0  ;;  %v693_v4 = vld [vmem:[%s2464_s3] sm:$0x7]  ;;  %v695_v6 = vld [vmem:[%s2464_s3 + $0x8] sm:$0x7]  ;;  %v1966_v20 = vld [vmem:[#allocation2 + $0x18] sm:$0xff] }
 0x2d6   : > { %1611 = vmatpush3.bf16.msra.mxu0 %v1262_v2  ;;  %1631 = vmatpush3.bf16.msra.mxu1 %v1262_v2  ;;  %v713_v3 = vshrl.u32 %v712_v1, 7  ;;  %v696_v7 = vld [vmem:[#allocation2] sm:$0xff]  ;;  %v749_v13 = vld [vmem:[#allocation2 + $0x9] sm:$0xff]  ;;  %v1998_v39 = vld [vmem:[#allocation2 + $0x38] sm:$0xff] }
 0x2d7   : > { %v748_v12 = vld [vmem:[#allocation2 + $0x1] sm:$0xff]  ;;  %v801_v17 = vld [vmem:[#allocation2 + $0xa] sm:$0xff]  ;;  %v1970_v22 = vld [vmem:[#allocation2 + $0x19] sm:$0xff] }
 0x2d8   : > { %v714_v8 = vsub.s32 0, %v713_v3  ;;  %v766_v9 = vsub.s32 1, %v713_v3  ;;  %v818_v10 = vsub.s32 2, %v713_v3  ;;  %v800_v16 = vld [vmem:[#allocation2 + $0x2] sm:$0xff]  ;;  %v1986_v32 = vld [vmem:[#allocation2 + $0x1a] sm:$0xff]  ;;  %v1996_v38 = vld [vmem:[#allocation2 + $0x30] sm:$0xff] }
 0x2d9   : > { %v1968_v21 = vld [vmem:[#allocation2 + $0x20] sm:$0xff]  ;;  %v2000_v40 = vld [vmem:[#allocation2 + $0x31] sm:$0xff]  ;;  %v2008_v46 = vld [vmem:[#allocation2 + $0x68] sm:$0xff] }
 0x2da   : > { %v1958_v14 = vrot.slane %v693_v4, %v714_v8  ;;  %v1960_v15 = vrot.slane %v693_v4, %v766_v9  ;;  %v1962_v18 = vrot.slane %v693_v4, %v818_v10  ;;  %v1964_v19 = vrot.slane %v694_v5, %v714_v8  ;;  %v1984_v31 = vld [vmem:[#allocation2 + $0x21] sm:$0xff]  ;;  %v2020_v52 = vld [vmem:[#allocation2 + $0x39] sm:$0xff]  ;;  %v2022_v53 = vld [vmem:[#allocation2 + $0x69] sm:$0xff] }
 0x2db   : > { %v1972_v23 = vrot.slane %v694_v5, %v766_v9  ;;  %v1974_v24 = vrot.slane %v694_v5, %v818_v10  ;;  %v1976_v25 = vrot.slane %v695_v6, %v714_v8  ;;  %v1978_v26 = vrot.slane %v695_v6, %v766_v9  ;;  %v1988_v33 = vld [vmem:[#allocation2 + $0x22] sm:$0xff]  ;;  %v2030_v59 = vld [vmem:[#allocation2 + $0x6a] sm:$0xff]  ;;  %v2040_v2 = vld [vmem:[#allocation2 + $0x32] sm:$0xff] }
 0x2dc   : > { %v716_v27 = vmul.f32 %v1958_v14, %v696_v7  ;;  %v717_v28 = vmul.f32 %v1958_v14, %v697_v11  ;;  %v768_v29 = vmul.f32 %v1960_v15, %v748_v12  ;;  %v769_v30 = vmul.f32 %v1960_v15, %v749_v13  ;;  %v2006_v45 = vld [vmem:[#allocation2 + $0x60] sm:$0xff]  ;;  %2476 = vst [vmem:[#allocation3_spill] sm:$0xff] %v2030_v59 }
 0x2dd   : > { %v820_v34 = vmul.f32 %v1962_v18, %v800_v16  ;;  %v821_v35 = vmul.f32 %v1962_v18, %v801_v17  ;;  %v872_v36 = vmul.f32 %v1964_v19, %v1966_v20  ;;  %v873_v37 = vmul.f32 %v1964_v19, %v1968_v21  ;;  %v2010_v47 = vld [vmem:[#allocation2 + $0x61] sm:$0xff] }
 0x2de   : > { %v784_v41 = vadd.f32 %v768_v29, %v716_v27  ;;  %v785_v42 = vadd.f32 %v769_v30, %v717_v28  ;;  %v924_v43 = vmul.f32 %v1972_v23, %v1970_v22  ;;  %v925_v44 = vmul.f32 %v1972_v23, %v1984_v31  ;;  %v2024_v54 = vld [vmem:[#allocation2 + $0x62] sm:$0xff]  ;;  %v2042_v3 = vld [vmem:[#allocation2 + $0x3a] sm:$0xff] }
 0x2df   : > { %v976_v48 = vmul.f32 %v1974_v24, %v1986_v32  ;;  %v977_v49 = vmul.f32 %v1974_v24, %v1988_v33  ;;  %v1029_v50 = vmul.f32 %v1976_v25, %v1996_v38  ;;  %v1030_v51 = vmul.f32 %v1976_v25, %v1998_v39  ;;  %v2056_v16 = vld [vmem:[#allocation2 + $0x80] sm:$0xff] }
 0x2e0   : > { %v836_v55 = vadd.f32 %v820_v34, %v784_v41  ;;  %v837_v56 = vadd.f32 %v821_v35, %v785_v42  ;;  %v1081_v57 = vmul.f32 %v1978_v26, %v2000_v40  ;;  %v1082_v58 = vmul.f32 %v1978_v26, %v2020_v52  ;;  %2477 = vst [vmem:[#allocation4_spill] sm:$0xff] %v2056_v16  ;;  %v2060_v27 = vld [vmem:[#allocation2 + $0x79] sm:$0xff]  ;;  %v2062_v28 = vld [vmem:[#allocation2 + $0x81] sm:$0xff] }
 0x2e1   : > { %v2032_v60 = vrot.slane %v695_v6, %v818_v10  ;;  %v724_v61 = vmul.f32 %v1958_v14, %v2006_v45  ;;  %v725_v62 = vmul.f32 %v1958_v14, %v2008_v46  ;;  %v776_v63 = vmul.f32 %v1960_v15, %v2010_v47  ;;  %v2054_v10 = vld [vmem:[#allocation2 + $0x78] sm:$0xff]  ;;  %2478 = vst [vmem:[#allocation5_spill] sm:$0xff] %v2060_v27 }
 0x2e2   : > { %v888_v0 = vadd.f32 %v872_v36, %v836_v55  ;;  %v889_v1 = vadd.f32 %v873_v37, %v837_v56  ;;  %v777_v4 = vmul.f32 %v1960_v15, %v2022_v53  ;;  %v828_v5 = vmul.f32 %v1962_v18, %v2024_v54  ;;  %2479 = vst [vmem:[#allocation6_spill] sm:$0xff] %v2062_v28  ;;  %v2070_v36 = vld [vmem:[#allocation2 + $0x7a] sm:$0xff]  ;;  %v2076_v55 = vld [vmem:[#allocation2 + $0x90] sm:$0xff] }
 0x2e3   : > { %v1133_v6 = vmul.f32 %v2032_v60, %v2040_v2  ;;  %v1134_v7 = vmul.f32 %v2032_v60, %v2042_v3  ;;  %v792_v8 = vadd.f32 %v776_v63, %v724_v61  ;;  %v829_v9 = vmul.f32 %v1962_v18, %v2030_v59  ;;  %2480 = vst [vmem:[#allocation7_spill] sm:$0xff] %v2070_v36  ;;  %v2078_v56 = vld [vmem:[#allocation2 + $0x98] sm:$0xff] }
 0x2e4   : > { %v940_v11 = vadd.f32 %v924_v43, %v888_v0  ;;  %v941_v12 = vadd.f32 %v925_v44, %v889_v1  ;;  %v793_v13 = vadd.f32 %v777_v4, %v725_v62  ;;  %v880_v17 = vmul.f32 %v1964_v19, %v2054_v10  ;;  %v2072_v43 = vld [vmem:[#allocation2 + $0x82] sm:$0xff] }
 0x2e5   : > { %v844_v29 = vadd.f32 %v828_v5, %v792_v8  ;;  %v881_v30 = vmul.f32 %v1964_v19, %v2056_v16  ;;  %v932_v34 = vmul.f32 %v1972_v23, %v2060_v27  ;;  %v933_v35 = vmul.f32 %v1972_v23, %v2062_v28  ;;  %2481 = vst [vmem:[#allocation8_spill] sm:$0xff] %v2072_v43  ;;  %v2088_v5 = vld [vmem:[#allocation2 + $0x99] sm:$0xff] }
 0x2e6   : > { %v992_v37 = vadd.f32 %v976_v48, %v940_v11  ;;  %v993_v41 = vadd.f32 %v977_v49, %v941_v12  ;;  %v845_v42 = vadd.f32 %v829_v9, %v793_v13  ;;  %v984_v44 = vmul.f32 %v1974_v24, %v2070_v36  ;;  %v2086_v49 = vld [vmem:[#allocation2 + $0x91] sm:$0xff]  ;;  %v2094_v11 = vld [vmem:[#allocation2 + $0x9a] sm:$0xff] }
 0x2e7   : > { %v896_v61 = vadd.f32 %v880_v17, %v844_v29  ;;  %v985_v62 = vmul.f32 %v1974_v24, %v2072_v43  ;;  %v1037_v63 = vmul.f32 %v1976_v25, %v2076_v55  ;;  %v1038_v48 = vmul.f32 %v1976_v25, %v2078_v56  ;;  %v2092_v9 = vld [vmem:[#allocation2 + $0x92] sm:$0xff] }
 0x2e8   : > { %v1045_v0 = vadd.f32 %v1029_v50, %v992_v37  ;;  %v1046_v1 = vadd.f32 %v1030_v51, %v993_v41  ;;  %v897_v4 = vadd.f32 %v881_v30, %v845_v42  ;;  %v1089_v8 = vmul.f32 %v1978_v26, %v2086_v49  ;;  %v2107_v41 = vld [vmem:[%s2465_s4] ss:$0 sm:$0xff] }
 0x2e9   : > { %v948_v12 = vadd.f32 %v932_v34, %v896_v61  ;;  %v1090_v13 = vmul.f32 %v1978_v26, %v2088_v5  ;;  %v1141_v17 = vmul.f32 %v2032_v60, %v2092_v9  ;;  %v1142_v50 = vmul.f32 %v2032_v60, %v2094_v11 }
 0x2ea   : > { %v1097_v51 = vadd.f32 %v1081_v57, %v1045_v0  ;;  %v1098_v29 = vadd.f32 %v1082_v58, %v1046_v1  ;;  %v949_v30 = vadd.f32 %v933_v35, %v897_v4  ;;  %v718_v37 = vmul.f32 %v1966_v20, %v1958_v14 }
 0x2eb   : > { %v1000_v34 = vadd.f32 %v984_v44, %v948_v12  ;;  %v719_v42 = vmul.f32 %v1968_v21, %v1958_v14  ;;  %v770_v61 = vmul.f32 %v1970_v22, %v1960_v15  ;;  %v771_v57 = vmul.f32 %v1984_v31, %v1960_v15 }
 0x2ec   : > { %v1149_v58 = vadd.f32 %v1133_v6, %v1097_v51  ;;  %v1150_v35 = vadd.f32 %v1134_v7, %v1098_v29  ;;  %v1001_v0 = vadd.f32 %v985_v62, %v949_v30  ;;  %v822_v20 = vmul.f32 %v1986_v32, %v1962_v18 }
 0x2ed   : > { %v1053_v1 = vadd.f32 %v1037_v63, %v1000_v34  ;;  %v786_v4 = vadd.f32 %v770_v61, %v718_v37  ;;  %v787_v59 = vadd.f32 %v771_v57, %v719_v42  ;;  %v823_v44 = vmul.f32 %v1988_v33, %v1962_v18 }
 0x2ee   : > { %v1172_v21 = vadd.f32 %v2107_v41, %v1149_v58  ;;  %v1173_v12 = vadd.f32 %v2107_v41, %v1150_v35  ;;  %v1054_v22 = vadd.f32 %v1038_v48, %v1001_v0  ;;  %v874_v31 = vmul.f32 %v1996_v38, %v1964_v19  ;;  %v2134_v0 = vld [vmem:[#allocation2 + $0x48] sm:$0xff] }
 0x2ef   : > { %v1105_v6 = vadd.f32 %v1089_v8, %v1053_v1  ;;  %v838_v7 = vadd.f32 %v822_v20, %v786_v4  ;;  %v839_v62 = vadd.f32 %v823_v44, %v787_v59  ;;  %v875_v32 = vmul.f32 %v1998_v39, %v1964_v19  ;;  %v2143_v44 = vld [vmem:[#allocation2 + $0x49] sm:$0xff] }
 0x2f0   : > { %v1188_v63 = vmax.f32 %v1172_v21, 0.0  ;;  %v1189_v51 = vmax.f32 %v1173_v12, 0.0  ;;  %v1106_v29 = vadd.f32 %v1090_v13, %v1054_v22  ;;  %v926_v33 = vmul.f32 %v2000_v40, %v1972_v23 }
 0x2f1   : > { %v1157_v30 = vadd.f32 %v1141_v17, %v1105_v6  ;;  %v890_v37 = vadd.f32 %v874_v31, %v838_v7  ;;  %v891_v34 = vadd.f32 %v875_v32, %v839_v62  ;;  %v927_v48 = vmul.f32 %v2020_v52, %v1972_v23  ;;  %v2136_v17 = vld [vmem:[#allocation2 + $0x50] sm:$0xff] }
 0x2f2   : > { %v1204_v42 = vmin.f32 %v1188_v63, 6.0  ;;  %v1205_v61 = vmin.f32 %v1189_v51, 6.0  ;;  %v1158_v8 = vadd.f32 %v1142_v50, %v1106_v29  ;;  %v978_v59 = vmul.f32 %v2040_v2, %v1974_v24  ;;  %v2145_v31 = vld [vmem:[#allocation2 + $0x51] sm:$0xff] }
 0x2f3   : > { %v1180_v57 = vadd.f32 %v2107_v41, %v1157_v30  ;;  %v942_v58 = vadd.f32 %v926_v33, %v890_v37  ;;  %v943_v35 = vadd.f32 %v927_v48, %v891_v34  ;;  %v979_v13 = vmul.f32 %v2042_v3, %v1974_v24  ;;  %v2149_v7 = vld [vmem:[#allocation2 + $0x4a] sm:$0xff]  ;;  %v2151_v62 = vld [vmem:[#allocation2 + $0x52] sm:$0xff] }
 0x2f4   : > { %v1220_v20 = vpack.c.bf16 %v1205_v61, %v1204_v42  ;;  %v1181_v1 = vadd.f32 %v2107_v41, %v1158_v8  ;;  %v1031_v50 = vmul.f32 %v1976_v25, %v2134_v0  ;;  %v1032_v4 = vmul.f32 %v1976_v25, %v2136_v17 }
 0x2f5   : > { %v1196_v21 = vmax.f32 %v1180_v57, 0.0  ;;  %v994_v12 = vadd.f32 %v978_v59, %v942_v58  ;;  %v995_v22 = vadd.f32 %v979_v13, %v943_v35  ;;  %v1083_v6 = vmul.f32 %v1978_v26, %v2143_v44 }
 0x2f6   : > { %1612 = vmatprep.mubr.msk.bf16.mxu0 %vm520_vm3, %v1220_v20  ;;  %v1197_v32 = vmax.f32 %v1181_v1, 0.0  ;;  %v1084_v63 = vmul.f32 %v1978_v26, %v2145_v31  ;;  %v1135_v51 = vmul.f32 %v2032_v60, %v2149_v7  ;;  %v1136_v29 = vmul.f32 %v2032_v60, %v2151_v62 }
 0x2f7   : > { %v1212_v33 = vmin.f32 %v1196_v21, 6.0  ;;  %v1047_v30 = vadd.f32 %v1031_v50, %v994_v12  ;;  %v1048_v37 = vadd.f32 %v1032_v4, %v995_v22  ;;  %v726_v34 = vmul.f32 %v2054_v10, %v1958_v14 }
 0x2f8   : > { %v1213_v48 = vmin.f32 %v1197_v32, 6.0  ;;  %v727_v42 = vmul.f32 %v2056_v16, %v1958_v14  ;;  %v778_v61 = vmul.f32 %v2060_v27, %v1960_v15  ;;  %v779_v8 = vmul.f32 %v2062_v28, %v1960_v15 }
 0x2f9   : > { %v1099_v59 = vadd.f32 %v1083_v6, %v1047_v30  ;;  %v1100_v57 = vadd.f32 %v1084_v63, %v1048_v37  ;;  %v830_v58 = vmul.f32 %v2070_v36, %v1962_v18  ;;  %v831_v35 = vmul.f32 %v2072_v43, %v1962_v18  ;;  %v2183_v30 = vld [vmem:[#allocation2 + $0xa8] sm:$0xff] }
 0x2fa   : > { %v1224_v13 = vpack.c.bf16 %v1213_v48, %v1212_v33  ;;  %v794_v20 = vadd.f32 %v778_v61, %v726_v34  ;;  %v795_v1 = vadd.f32 %v779_v8, %v727_v42  ;;  %v882_v50 = vmul.f32 %v2076_v55, %v1964_v19  ;;  %v2189_v34 = vld [vmem:[#allocation2 + $0xb0] sm:$0xff] }
 0x2fb   : > { %v1151_v4 = vadd.f32 %v1135_v51, %v1099_v59  ;;  %v1152_v21 = vadd.f32 %v1136_v29, %v1100_v57  ;;  %v883_v12 = vmul.f32 %v2078_v56, %v1964_v19  ;;  %v934_v22 = vmul.f32 %v2086_v49, %v1972_v23  ;;  %v2193_v42 = vld [vmem:[#allocation2 + $0xa9] sm:$0xff]  ;;  %v2197_v57 = vld [vmem:[#allocation2 + $0xb1] sm:$0xff] }
 0x2fc   : > { %1620 = vmatprep.mubr.msk.bf16.mxu1 %vm520_vm3, %v1224_v13  ;;  %v846_v6 = vadd.f32 %v830_v58, %v794_v20  ;;  %v847_v32 = vadd.f32 %v831_v35, %v795_v1  ;;  %v935_v63 = vmul.f32 %v2088_v5, %v1972_v23  ;;  %v986_v33 = vmul.f32 %v2092_v9, %v1974_v24  ;;  %v2201_v35 = vld [vmem:[#allocation2 + $0xaa] sm:$0xff] }
 0x2fd   : > { %v1174_v51 = vadd.f32 %v2107_v41, %v1151_v4  ;;  %v1175_v29 = vadd.f32 %v2107_v41, %v1152_v21  ;;  %v987_v37 = vmul.f32 %v2094_v11, %v1974_v24  ;;  %v1039_v48 = vmul.f32 %v1976_v25, %v2183_v30  ;;  %v2205_v4 = vld [vmem:[#allocation2 + $0xb2] sm:$0xff] }
 0x2fe   : > { %v898_v61 = vadd.f32 %v882_v50, %v846_v6  ;;  %v899_v8 = vadd.f32 %v883_v12, %v847_v32  ;;  %v1040_v59 = vmul.f32 %v1976_v25, %v2189_v34  ;;  %v1091_v58 = vmul.f32 %v1978_v26, %v2193_v42 }
 0x2ff   : > { %v1190_v13 = vmax.f32 %v1174_v51, 0.0  ;;  %v1191_v20 = vmax.f32 %v1175_v29, 0.0  ;;  %v1092_v1 = vmul.f32 %v1978_v26, %v2197_v57  ;;  %v1143_v50 = vmul.f32 %v2032_v60, %v2201_v35 }
 0x300   : > { %v950_v21 = vadd.f32 %v934_v22, %v898_v61  ;;  %v951_v12 = vadd.f32 %v935_v63, %v899_v8  ;;  %v1144_v6 = vmul.f32 %v2032_v60, %v2205_v4  ;;  %v720_v32 = vmul.f32 %v1996_v38, %v1958_v14 }
 0x301   : > { %v1206_v43 = vmin.f32 %v1190_v13, 6.0  ;;  %v1207_v36 = vmin.f32 %v1191_v20, 6.0  ;;  %v721_v51 = vmul.f32 %v1998_v39, %v1958_v14  ;;  %v772_v29 = vmul.f32 %v2000_v40, %v1960_v15 }
 0x302   : > { %v1002_v28 = vadd.f32 %v986_v33, %v950_v21  ;;  %v1003_v27 = vadd.f32 %v987_v37, %v951_v12  ;;  %v773_v22 = vmul.f32 %v2020_v52, %v1960_v15  ;;  %v824_v63 = vmul.f32 %v2040_v2, %v1962_v18 }
 0x303   : > { %v1221_v61 = vpack.c.bf16 %v1207_v36, %v1206_v43  ;;  %v788_v8 = vadd.f32 %v772_v29, %v720_v32  ;;  %v825_v38 = vmul.f32 %v2042_v3, %v1962_v18  ;;  %v876_v13 = vmul.f32 %v2134_v0, %v1964_v19  ;;  %v2482_v29 = vld [vmem:[#allocation3_spill] sm:$0xff] }
 0x304   : > { %v1055_v39 = vadd.f32 %v1039_v48, %v1002_v28  ;;  %v1056_v20 = vadd.f32 %v1040_v59, %v1003_v27  ;;  %v789_v16 = vadd.f32 %v773_v22, %v721_v51  ;;  %v877_v40 = vmul.f32 %v2136_v17, %v1964_v19 }
 0x305   : > { %1613 = vmatmul.mubr.msk.bf16.vlgmr.msra.gmra.mrb[0].mxu0 %vm520_vm3, %v1221_v61  ;;  %v840_v52 = vadd.f32 %v824_v63, %v788_v8  ;;  %v928_v2 = vmul.f32 %v2143_v44, %v1972_v23  ;;  %v929_v36 = vmul.f32 %v2145_v31, %v1972_v23  ;;  %v980_v3 = vmul.f32 %v2149_v7, %v1974_v24 }
 0x306   : > { %v1107_v43 = vadd.f32 %v1091_v58, %v1055_v39  ;;  %v1108_v33 = vadd.f32 %v1092_v1, %v1056_v20  ;;  %v841_v28 = vadd.f32 %v825_v38, %v789_v16  ;;  %v981_v27 = vmul.f32 %v2151_v62, %v1974_v24 }
 0x307   : > { %v892_v37 = vadd.f32 %v876_v13, %v840_v52  ;;  %v1033_v48 = vmul.f32 %v1976_v25, %v2006_v45  ;;  %v1034_v59 = vmul.f32 %v1976_v25, %v2008_v46  ;;  %v1085_v21 = vmul.f32 %v1978_v26, %v2010_v47 }
 0x308   : > { %v1159_v12 = vadd.f32 %v1143_v50, %v1107_v43  ;;  %v1160_v32 = vadd.f32 %v1144_v6, %v1108_v33  ;;  %v893_v51 = vadd.f32 %v877_v40, %v841_v28  ;;  %v1086_v58 = vmul.f32 %v1978_v26, %v2022_v53 }
 0x309   : > { %v944_v16 = vadd.f32 %v928_v2, %v892_v37  ;;  %v1137_v1 = vmul.f32 %v2032_v60, %v2024_v54  ;;  %v1138_v22 = vmul.f32 %v2032_v60, %v2482_v29  ;;  %v728_v63 = vmul.f32 %v2076_v55, %v1958_v14 }
 0x30a   : > { %v1182_v61 = vadd.f32 %v2107_v41, %v1159_v12  ;;  %v1183_v8 = vadd.f32 %v2107_v41, %v1160_v32  ;;  %v945_v50 = vadd.f32 %v929_v36, %v893_v51  ;;  %v729_v6 = vmul.f32 %v2078_v56, %v1958_v14 }
 0x30b   : > { %v996_v38 = vadd.f32 %v980_v3, %v944_v16  ;;  %v780_v13 = vmul.f32 %v2086_v49, %v1960_v15  ;;  %v781_v39 = vmul.f32 %v2088_v5, %v1960_v15  ;;  %v832_v20 = vmul.f32 %v2092_v9, %v1962_v18 }
 0x30c   : > { %v1198_v40 = vmax.f32 %v1182_v61, 0.0  ;;  %v1199_v55 = vmax.f32 %v1183_v8, 0.0  ;;  %v997_v52 = vadd.f32 %v981_v27, %v945_v50  ;;  %v833_v2 = vmul.f32 %v2094_v11, %v1962_v18  ;;  %v2276_v8 = vld [vmem:[#allocation2 + $0xc8] sm:$0xff] }
 0x30d   : > { %v1049_v36 = vadd.f32 %v1033_v48, %v996_v38  ;;  %v796_v43 = vadd.f32 %v780_v13, %v728_v63  ;;  %v797_v33 = vadd.f32 %v781_v39, %v729_v6  ;;  %v884_v56 = vmul.f32 %v2183_v30, %v1964_v19  ;;  %v2278_v50 = vld [vmem:[#allocation2 + $0xc1] sm:$0xff]  ;;  %v2285_v38 = vld [vmem:[#allocation2 + $0xc9] sm:$0xff] }
 0x30e   : > { %v1214_v3 = vmin.f32 %v1198_v40, 6.0  ;;  %v1215_v49 = vmin.f32 %v1199_v55, 6.0  ;;  %v1050_v28 = vadd.f32 %v1034_v59, %v997_v52  ;;  %v885_v5 = vmul.f32 %v2189_v34, %v1964_v19  ;;  %v2292_v52 = vld [vmem:[#allocation2 + $0xc2] sm:$0xff] }
 0x30f   : > { %v1101_v37 = vadd.f32 %v1085_v21, %v1049_v36  ;;  %v848_v9 = vadd.f32 %v832_v20, %v796_v43  ;;  %v849_v12 = vadd.f32 %v833_v2, %v797_v33  ;;  %v936_v27 = vmul.f32 %v2193_v42, %v1972_v23  ;;  %v2274_v21 = vld [vmem:[#allocation2 + $0xc0] sm:$0xff] }
 0x310   : > { %v1225_v32 = vpack.c.bf16 %v1215_v49, %v1214_v3  ;;  %v1102_v11 = vadd.f32 %v1086_v58, %v1050_v28  ;;  %v937_v48 = vmul.f32 %v2197_v57, %v1972_v23  ;;  %v988_v51 = vmul.f32 %v2201_v35, %v1974_v24 }
 0x311   : > { %v1153_v16 = vadd.f32 %v1137_v1, %v1101_v37  ;;  %v900_v63 = vadd.f32 %v884_v56, %v848_v9  ;;  %v901_v59 = vadd.f32 %v885_v5, %v849_v12  ;;  %v989_v61 = vmul.f32 %v2205_v4, %v1974_v24 }
 0x312   : > { %1621 = vmatmul.mubr.msk.bf16.vlgmr.msra.gmra.mrb[0].mxu1 %vm520_vm3, %v1225_v32  ;;  %v1154_v58 = vadd.f32 %v1138_v22, %v1102_v11  ;;  %v1041_v6 = vmul.f32 %v1976_v25, %v2274_v21  ;;  %v1042_v1 = vmul.f32 %v1976_v25, %v2276_v8  ;;  %v1093_v13 = vmul.f32 %v1978_v26, %v2278_v50  ;;  %v2294_v22 = vld [vmem:[#allocation2 + $0xca] sm:$0xff] }
 0x313   : > { %v1176_v39 = vadd.f32 %v2107_v41, %v1153_v16  ;;  %v952_v20 = vadd.f32 %v936_v27, %v900_v63  ;;  %v953_v40 = vadd.f32 %v937_v48, %v901_v59  ;;  %v1094_v55 = vmul.f32 %v1978_v26, %v2285_v38 }
 0x314   : > { %v1177_v2 = vadd.f32 %v2107_v41, %v1154_v58  ;;  %v1145_v36 = vmul.f32 %v2032_v60, %v2292_v52  ;;  %v1146_v43 = vmul.f32 %v2032_v60, %v2294_v22  ;;  %v722_v33 = vmul.f32 %v2134_v0, %v1958_v14 }
 0x315   : > { %v1192_v56 = vmax.f32 %v1176_v39, 0.0  ;;  %v1004_v3 = vadd.f32 %v988_v51, %v952_v20  ;;  %v1005_v49 = vadd.f32 %v989_v61, %v953_v40  ;;  %v723_v28 = vmul.f32 %v2136_v17, %v1958_v14  ;;  %v2483_v20 = vld [vmem:[#allocation4_spill] sm:$0xff] }
 0x316   : > { %v1193_v5 = vmax.f32 %v1177_v2, 0.0  ;;  %v774_v37 = vmul.f32 %v2143_v44, %v1960_v15  ;;  %v775_v9 = vmul.f32 %v2145_v31, %v1960_v15  ;;  %v826_v12 = vmul.f32 %v2149_v7, %v1962_v18  ;;  %v2484_v2 = vld [vmem:[#allocation5_spill] sm:$0xff] }
 0x317   : > { %v1208_v27 = vmin.f32 %v1192_v56, 6.0  ;;  %v1057_v32 = vadd.f32 %v1041_v6, %v1004_v3  ;;  %v1058_v11 = vadd.f32 %v1042_v1, %v1005_v49  ;;  %v827_v0 = vmul.f32 %v2151_v62, %v1962_v18  ;;  %v2486_v56 = vld [vmem:[#allocation7_spill] sm:$0xff]  ;;  %v2487_v49 = vld [vmem:[#allocation8_spill] sm:$0xff] }
 0x318   : > { %v1209_v48 = vmin.f32 %v1193_v5, 6.0  ;;  %v790_v51 = vadd.f32 %v774_v37, %v722_v33  ;;  %v791_v16 = vadd.f32 %v775_v9, %v723_v28  ;;  %v878_v17 = vmul.f32 %v1964_v19, %v2006_v45 }
 0x319   : > { %v1109_v63 = vadd.f32 %v1093_v13, %v1057_v32  ;;  %v1110_v44 = vadd.f32 %v1094_v55, %v1058_v11  ;;  %v879_v31 = vmul.f32 %v1964_v19, %v2008_v46  ;;  %v930_v7 = vmul.f32 %v1972_v23, %v2010_v47 }
 0x31a   : > { %v1222_v59 = vpack.c.bf16 %v1209_v48, %v1208_v27  ;;  %v842_v61 = vadd.f32 %v826_v12, %v790_v51  ;;  %v843_v58 = vadd.f32 %v827_v0, %v791_v16  ;;  %v931_v62 = vmul.f32 %v1972_v23, %v2022_v53 }
 0x31b   : > { %v1161_v6 = vadd.f32 %v1145_v36, %v1109_v63  ;;  %v1162_v1 = vadd.f32 %v1146_v43, %v1110_v44  ;;  %v982_v39 = vmul.f32 %v1974_v24, %v2024_v54  ;;  %v983_v45 = vmul.f32 %v1974_v24, %v2482_v29  ;;  %v2485_v36 = vld [vmem:[#allocation6_spill] sm:$0xff] }
 0x31c   : > { %1616 = vmatprep.mubr.msk.bf16.mxu0 %vm520_vm3, %v1222_v59  ;;  %v894_v46 = vadd.f32 %v878_v17, %v842_v61  ;;  %v895_v13 = vadd.f32 %v879_v31, %v843_v58  ;;  %v1035_v47 = vmul.f32 %v1976_v25, %v2054_v10  ;;  %v1036_v40 = vmul.f32 %v1976_v25, %v2483_v20  ;;  %v1023_v59 = vld [vmem:[#allocation2 + $0xd8] sm:$0xff] }
 0x31d   : > { %v1184_v53 = vadd.f32 %v2107_v41, %v1161_v6  ;;  %v1185_v55 = vadd.f32 %v2107_v41, %v1162_v1  ;;  %v1087_v54 = vmul.f32 %v1978_v26, %v2484_v2  ;;  %v1088_v29 = vmul.f32 %v1978_v26, %v2485_v36  ;;  %v1076_v6 = vld [vmem:[#allocation2 + $0xe1] sm:$0xff] }
 0x31e   : > { %v946_v43 = vadd.f32 %v930_v7, %v894_v46  ;;  %v947_v33 = vadd.f32 %v931_v62, %v895_v13  ;;  %v1139_v3 = vmul.f32 %v2032_v60, %v2486_v56  ;;  %v1140_v10 = vmul.f32 %v2032_v60, %v2487_v49  ;;  %v1075_v62 = vld [vmem:[#allocation2 + $0xd9] sm:$0xff]  ;;  %v1128_v13 = vld [vmem:[#allocation2 + $0xe2] sm:$0xff] }
 0x31f   : > { %v1200_v28 = vmax.f32 %v1184_v53, 0.0  ;;  %v1201_v5 = vmax.f32 %v1185_v55, 0.0  ;;  %v730_v37 = vmul.f32 %v2183_v30, %v1958_v14  ;;  %v731_v9 = vmul.f32 %v2189_v34, %v1958_v14 }
 0x320   : > { %v998_v12 = vadd.f32 %v982_v39, %v946_v43  ;;  %v999_v27 = vadd.f32 %v983_v45, %v947_v33  ;;  %v782_v32 = vmul.f32 %v2193_v42, %v1960_v15  ;;  %v783_v11 = vmul.f32 %v2197_v57, %v1960_v15 }
 0x321   : > { %v1216_v0 = vmin.f32 %v1200_v28, 6.0  ;;  %v1217_v48 = vmin.f32 %v1201_v5, 6.0  ;;  %v834_v51 = vmul.f32 %v2201_v35, %v1962_v18  ;;  %v835_v16 = vmul.f32 %v2205_v4, %v1962_v18  ;;  %v1024_v18 = vld [vmem:[#allocation2 + $0xe0] sm:$0xff] }
 0x322   : > { %v1051_v30 = vadd.f32 %v1035_v47, %v998_v12  ;;  %v1052_v17 = vadd.f32 %v1036_v40, %v999_v27  ;;  %v798_v63 = vadd.f32 %v782_v32, %v730_v37  ;;  %v799_v14 = vadd.f32 %v783_v11, %v731_v9  ;;  %v2380_v12 = vld [vmem:[%s2467_s6] ss:$0 sm:$0xff]  ;;  %v1363_v32 = vld [vmem:[%s1846_s18 + $0x10] sm:$0xff] }
 0x323   : > { %v1226_v34 = vpack.c.bf16 %v1217_v48, %v1216_v0  ;;  %v886_v44 = vmul.f32 %v2274_v21, %v1964_v19  ;;  %v887_v42 = vmul.f32 %v2276_v8, %v1964_v19  ;;  %v938_v15 = vmul.f32 %v2278_v50, %v1972_v23  ;;  %v1361_v0 = vld [vmem:[%s1846_s18] sm:$0xff] }
 0x324   : > { %v1103_v57 = vadd.f32 %v1087_v54, %v1051_v30  ;;  %v1104_v31 = vadd.f32 %v1088_v29, %v1052_v17  ;;  %v850_v35 = vadd.f32 %v834_v51, %v798_v63  ;;  %v851_v7 = vadd.f32 %v835_v16, %v799_v14  ;;  %v1364_v16 = vld [vmem:[%s1846_s18 + $0x18] sm:$0xff]  ;;  %v1362_v14 = vld [vmem:[%s1846_s18 + $0x8] sm:$0xff] }
 0x325   : > { %1624 = vmatprep.mubr.msk.bf16.mxu1 %vm520_vm3, %v1226_v34  ;;  %v939_v4 = vmul.f32 %v2285_v38, %v1972_v23  ;;  %v990_v21 = vmul.f32 %v2292_v52, %v1974_v24  ;;  %v991_v19 = vmul.f32 %v2294_v22, %v1974_v24  ;;  %v1043_v1 = vmul.f32 %v1976_v25, %v1023_v59  ;;  %v1127_v52 = vld [vmem:[#allocation2 + $0xda] sm:$0xff] }
 0x326   : > { %v1155_v8 = vadd.f32 %v1139_v3, %v1103_v57  ;;  %v1156_v61 = vadd.f32 %v1140_v10, %v1104_v31  ;;  %v902_v50 = vadd.f32 %v886_v44, %v850_v35  ;;  %v903_v58 = vadd.f32 %v887_v42, %v851_v7  ;;  %v1371_v31 = vld [vmem:[%s1846_s18 + $0x50] sm:$0xff]  ;;  %v1369_v59 = vld [vmem:[%s1846_s18 + $0x40] sm:$0xff] }
 0x327   : > { %v1044_v39 = vmul.f32 %v1976_v25, %v1024_v18  ;;  %v1095_v24 = vmul.f32 %v1978_v26, %v1075_v62  ;;  %v1096_v22 = vmul.f32 %v1978_v26, %v1076_v6  ;;  %v1147_v55 = vmul.f32 %v2032_v60, %v1127_v52 }
 0x328   : > { %v1178_v45 = vadd.f32 %v2107_v41, %v1155_v8  ;;  %v1179_v23 = vadd.f32 %v2107_v41, %v1156_v61  ;;  %v954_v38 = vadd.f32 %v938_v15, %v902_v50  ;;  %v955_v46 = vadd.f32 %v939_v4, %v903_v58  ;;  %v1370_v50 = vld [vmem:[%s1846_s18 + $0x48] sm:$0xff] }
 0x329   : > { %v1148_v25 = vmul.f32 %v2032_v60, %v1128_v13 }
 0x32a   : > { %v1194_v47 = vmax.f32 %v1178_v45, 0.0  ;;  %v1195_v20 = vmax.f32 %v1179_v23, 0.0  ;;  %v1006_v40 = vadd.f32 %v990_v21, %v954_v38  ;;  %v1007_v53 = vadd.f32 %v991_v19, %v955_v46  ;;  %v1372_v21 = vld [vmem:[%s1846_s18 + $0x58] sm:$0xff]  ;;  %v1367_v45 = vld [vmem:[%s1846_s18 + $0x30] sm:$0xff]  ;;  %v1365_v46 = vld [vmem:[%s1846_s18 + $0x20] sm:$0xff] }
 0x32c   : > { %v1210_v2 = vmin.f32 %v1194_v47, 6.0  ;;  %v1211_v54 = vmin.f32 %v1195_v20, 6.0  ;;  %v1059_v36 = vadd.f32 %v1043_v1, %v1006_v40  ;;  %v1060_v29 = vadd.f32 %v1044_v39, %v1007_v53  ;;  %v1366_v40 = vld [vmem:[%s1846_s18 + $0x28] sm:$0xff] }
 0x32e   : > { %v1223_v43 = vpack.c.bf16 %v1211_v54, %v1210_v2  ;;  %v1111_v33 = vadd.f32 %v1095_v24, %v1059_v36  ;;  %v1112_v56 = vadd.f32 %v1096_v22, %v1060_v29  ;;  %v1368_v24 = vld [vmem:[%s1846_s18 + $0x38] sm:$0xff]  ;;  %v1375_v36 = vld [vmem:[%s1846_s18 + $0x70] sm:$0xff] }
 0x330   : > { %1617 = vmatmul.mubr.msk.bf16.gmra.mrb[4].mxu0 %vm520_vm3, %v1223_v43  ;;  %v1163_v26 = vadd.f32 %v1147_v55, %v1111_v33  ;;  %v1164_v3 = vadd.f32 %v1148_v25, %v1112_v56  ;;  %v1373_v33 = vld [vmem:[%s1846_s18 + $0x60] sm:$0xff] }
 0x332   : > { %v1186_v49 = vadd.f32 %v2107_v41, %v1163_v26  ;;  %v1187_v10 = vadd.f32 %v2107_v41, %v1164_v3  ;;  %v1376_v3 = vld [vmem:[%s1846_s18 + $0x78] sm:$0xff] }
 0x334   : > { %v1202_v28 = vmax.f32 %v1186_v49, 0.0  ;;  %v1203_v60 = vmax.f32 %v1187_v10, 0.0 }
 0x336   : > { %v1218_v5 = vmin.f32 %v1202_v28, 6.0  ;;  %v1219_v37 = vmin.f32 %v1203_v60, 6.0  ;;  %v1374_v60 = vld [vmem:[%s1846_s18 + $0x68] sm:$0xff] }
 0x338   : > { %v1227_v9 = vpack.c.bf16 %v1219_v37, %v1218_v5 }
 0x33a   : > { %1625 = vmatmul.mubr.msk.bf16.gmra.mrb[4].mxu1 %vm520_vm3, %v1227_v9 }
 0x3d8   : > { %v1614_v27 = vpop.f32.mrb[0].mxu0 }
 0x3d9   : > { %v1307_v11 = vadd.f32 %v1614_v27, %v2380_v12  ;;  %v1298_v41 = vpop.f32.mrb[1].mxu0 }
 0x3da   : > { %v1299_v48 = vadd.f32 %v2380_v12, %v1298_v41  ;;  %v1615_v51 = vpop.f32.mrb[2].mxu0 }
 0x3db   : > { %v1379_v30 = vadd.f32 %v1363_v32, %v1307_v11  ;;  %v1310_v17 = vadd.f32 %v1615_v51, %v2380_v12  ;;  %v1301_v63 = vpop.f32.mrb[3].mxu0 }
 0x3dc   : > { %v1377_v34 = vadd.f32 %v1361_v0, %v1299_v48  ;;  %v1302_v44 = vadd.f32 %v2380_v12, %v1301_v63 }
 0x3dd   : > { %1395 = vst.msk [vmem:[%s1860_s25 + $0x10] sm:$0xff] %vm361_vm2, %v1379_v30  ;;  %v1380_v42 = vadd.f32 %v1364_v16, %v1310_v17 }
 0x3de   : > { %1393 = vst.msk [vmem:[%s1860_s25] sm:$0xff] %vm361_vm2, %v1377_v34  ;;  %v1378_v15 = vadd.f32 %v1362_v14, %v1302_v44 }
 0x3df   : > { %1396 = vst.msk [vmem:[%s1860_s25 + $0x18] sm:$0xff] %vm361_vm2, %v1380_v42 }
 0x3e0   : > { %1394 = vst.msk [vmem:[%s1860_s25 + $0x8] sm:$0xff] %vm361_vm2, %v1378_v15 }
 0x3e5   : > { %v1622_v57 = vpop.f32.mrb[0].mxu1 }
 0x3e6   : > { %v1339_v35 = vadd.f32 %v1622_v57, %v2380_v12  ;;  %v1330_v7 = vpop.f32.mrb[1].mxu1 }
 0x3e7   : > { %v1331_v18 = vadd.f32 %v2380_v12, %v1330_v7  ;;  %v1623_v4 = vpop.f32.mrb[2].mxu1 }
 0x3e8   : > { %v1387_v19 = vadd.f32 %v1371_v31, %v1339_v35  ;;  %v1342_v8 = vadd.f32 %v1623_v4, %v2380_v12  ;;  %v1333_v61 = vpop.f32.mrb[3].mxu1 }
 0x3e9   : > { %v1385_v58 = vadd.f32 %v1369_v59, %v1331_v18  ;;  %v1334_v62 = vadd.f32 %v2380_v12, %v1333_v61 }
 0x3ea   : > { %1403 = vst.msk [vmem:[%s1860_s25 + $0x50] sm:$0xff] %vm361_vm2, %v1387_v19  ;;  %v1388_v6 = vadd.f32 %v1372_v21, %v1342_v8 }
 0x3eb   : > { %1401 = vst.msk [vmem:[%s1860_s25 + $0x40] sm:$0xff] %vm361_vm2, %v1385_v58  ;;  %v1386_v1 = vadd.f32 %v1370_v50, %v1334_v62 }
 0x3ec   : > { %1404 = vst.msk [vmem:[%s1860_s25 + $0x58] sm:$0xff] %vm361_vm2, %v1388_v6 }
 0x3ed   : > { %1402 = vst.msk [vmem:[%s1860_s25 + $0x48] sm:$0xff] %vm361_vm2, %v1386_v1 }
 0x403   : > { %v1618_v39 = vpop.f32.mrb[4].mxu0 }
 0x404   : > { %v1323_v23 = vadd.f32 %v1618_v39, %v2380_v12  ;;  %v1314_v38 = vpop.f32.mrb[5].mxu0 }
 0x405   : > { %v1315_v52 = vadd.f32 %v2380_v12, %v1314_v38  ;;  %v1619_v13 = vpop.f32.mrb[6].mxu0 }
 0x406   : > { %v1383_v22 = vadd.f32 %v1367_v45, %v1323_v23  ;;  %v1326_v47 = vadd.f32 %v1619_v13, %v2380_v12  ;;  %v1317_v20 = vpop.f32.mrb[7].mxu0 }
 0x407   : > { %v1381_v53 = vadd.f32 %v1365_v46, %v1315_v52  ;;  %v1318_v55 = vadd.f32 %v2380_v12, %v1317_v20 }
 0x408   : > { %1399 = vst.msk [vmem:[%s1860_s25 + $0x30] sm:$0xff] %vm361_vm2, %v1383_v22  ;;  %v1384_v25 = vadd.f32 %v1368_v24, %v1326_v47 }
 0x409   : > { %1397 = vst.msk [vmem:[%s1860_s25 + $0x20] sm:$0xff] %vm361_vm2, %v1381_v53  ;;  %v1382_v2 = vadd.f32 %v1366_v40, %v1318_v55 }
 0x40a   : > { %1400 = vst.msk [vmem:[%s1860_s25 + $0x38] sm:$0xff] %vm361_vm2, %v1384_v25 }
 0x40b   : > { %1398 = vst.msk [vmem:[%s1860_s25 + $0x28] sm:$0xff] %vm361_vm2, %v1382_v2 }
 0x40d   : > { %v1626_v54 = vpop.f32.mrb[4].mxu1 }
 0x40e   : > { %v1355_v29 = vadd.f32 %v1626_v54, %v2380_v12  ;;  %v1346_v43 = vpop.f32.mrb[5].mxu1 }
 0x40f   : > { %v1347_v56 = vadd.f32 %v2380_v12, %v1346_v43  ;;  %v1627_v26 = vpop.f32.mrb[6].mxu1 }
 0x410   : > { %v1391_v49 = vadd.f32 %v1375_v36, %v1355_v29  ;;  %v1358_v10 = vadd.f32 %v1627_v26, %v2380_v12  ;;  %v1349_v28 = vpop.f32.mrb[7].mxu1 }
 0x411   : > { %v1389_v5 = vadd.f32 %v1373_v33, %v1347_v56  ;;  %v1350_v37 = vadd.f32 %v2380_v12, %v1349_v28 }
 0x412   : > { %1407 = vst.msk [vmem:[%s1860_s25 + $0x70] sm:$0xff] %vm361_vm2, %v1391_v49  ;;  %v1392_v9 = vadd.f32 %v1376_v3, %v1358_v10 }
 0x413   : > { %1405 = vst.msk [vmem:[%s1860_s25 + $0x60] sm:$0xff] %vm361_vm2, %v1389_v5  ;;  %v1390_v27 = vadd.f32 %v1374_v60, %v1350_v37 }
 0x414   : > { %1408 = vst.msk [vmem:[%s1860_s25 + $0x78] sm:$0xff] %vm361_vm2, %v1392_v9 }
 0x415   : > { %1406 = vst.msk [vmem:[%s1860_s25 + $0x68] sm:$0xff] %vm361_vm2, %v1390_v27 }
 0x416 PF: > { %s17_s28 = sadd.s32 1, %s1721_s28   ;;  %s2488_s24 = smov %s1713_s26 }
 0x417   : > { %p14_p11 = scmp.ge.s32.totalorder %s17_s28, 6   ;;  %s2489_s25 = smov %s1717_s27 }
 0x418   : > { %s2490_s26 = smov %s2493_s29  ;;  %s2491_s27 = smov %s2497_s30 }
 0x419   :  { %16 = sbr.rel (!%p14_p11) target bundleno = 3 (0x3), region = 101 }

</bundles_post_ra>
